<compile_context>
chip_gen: v7x
topology: tpu7x:2x2x1
jax: 0.10.0
libtpu: 0.0.40
codegen_flags: <defaults>
</compile_context>

<pallas_src>
import math
import numpy as np
import jax
import jax.numpy as jnp
from jax.experimental import pallas as pl
from jax.experimental.pallas import tpu as pltpu


# ---------------------------------------------------------------------------
# Deterministic wavelet-matrix construction (mirrors DWT_3D.get_matrix()).
# Haar coefficients hard-coded (pywt.Wavelet('haar').rec_lo / rec_hi).
# ---------------------------------------------------------------------------
_HAAR_REC_LO = (0.7071067811865476, 0.7071067811865476)
_HAAR_REC_HI = (0.7071067811865476, -0.7071067811865476)


def build_dwt_matrices(D, H, W, band_low=_HAAR_REC_LO, band_high=_HAAR_REC_HI):
    """NumPy float64 analysis matrices, exactly as DWT_3D.get_matrix builds them."""
    band_length = len(band_low)
    assert band_length == len(band_high) and band_length % 2 == 0
    band_length_half = band_length // 2

    L1 = max(H, W)
    L = math.floor(L1 / 2)
    matrix_h = np.zeros((L, L1 + band_length - 2))
    matrix_g = np.zeros((L1 - L, L1 + band_length - 2))
    end = None if band_length_half == 1 else -band_length_half + 1

    index = 0
    for i in range(L):
        for j in range(band_length):
            matrix_h[i, index + j] = band_low[j]
        index += 2
    matrix_h_0 = matrix_h[0:H // 2, 0:H + band_length - 2]
    matrix_h_1 = matrix_h[0:W // 2, 0:W + band_length - 2]
    matrix_h_2 = matrix_h[0:D // 2, 0:D + band_length - 2]

    index = 0
    for i in range(L1 - L):
        for j in range(band_length):
            matrix_g[i, index + j] = band_high[j]
        index += 2
    matrix_g_0 = matrix_g[0:H - H // 2, 0:H + band_length - 2]
    matrix_g_1 = matrix_g[0:W - W // 2, 0:W + band_length - 2]
    matrix_g_2 = matrix_g[0:D - D // 2, 0:D + band_length - 2]

    matrix_h_0 = matrix_h_0[:, band_length_half - 1:end]
    matrix_h_1 = np.transpose(matrix_h_1[:, band_length_half - 1:end])
    matrix_h_2 = matrix_h_2[:, band_length_half - 1:end]
    matrix_g_0 = matrix_g_0[:, band_length_half - 1:end]
    matrix_g_1 = np.transpose(matrix_g_1[:, band_length_half - 1:end])
    matrix_g_2 = matrix_g_2[:, band_length_half - 1:end]

    # mL0: (H/2, H), mL1: (W, W/2), mL2: (D/2, D)  (same shapes for high-pass)
    return (matrix_h_0, matrix_h_1, matrix_h_2,
            matrix_g_0, matrix_g_1, matrix_g_2)


# ---------------------------------------------------------------------------
# Pallas kernel: one grid step processes bt flattened volumes of shape (D, F),
# F = H*W, producing all 8 subbands stacked inside the (D, F) output tile.
# ---------------------------------------------------------------------------
def _dwt3d_kernel(k_ref, m2_ref, x_ref, y_ref):
    # k_ref : (F, F)     fused height+width analysis matrix (kron(M0.T, M1))
    # m2_ref: (D, D)     stacked [low; high] depth analysis matrix
    # x_ref : (bt, D, F) lane-dense input block
    # y_ref : (bt, D, F) lane-dense output block (all 8 subbands)
    x = x_ref[...]

    # Combined H + W transform: single lane-axis contraction (MXU).
    # z[b, d, p*W + q] = sum_{h,w} x[b, d, h*W + w] * M0[p, h] * M1[w, q]
    # einsum collapses (b, d) into one M dim -> one well-shaped matmul.
    z = jnp.einsum('bdf,fg->bdg', x, k_ref[...],
                   preferred_element_type=jnp.float32)

    # Depth transform: contract the depth axis against the stacked matrix.
    # y[b, r, g] = sum_d M2[r, d] * z[b, d, g]
    y_ref[...] = jnp.einsum('rd,bdf->brf', m2_ref[...], z,
                            preferred_element_type=jnp.float32)


def dwt_3d(x, block_rows=None):
    """x: (N, C, D, H, W) float32 -> 8 arrays of shape (N, C, D/2, H/2, W/2)."""
    N, C, D, H, W = x.shape
    assert D % 2 == 0 and H % 2 == 0 and W % 2 == 0, "even D/H/W required"
    # Inherited from DWT_3D.get_matrix (it sizes the banded matrices from
    # max(H, W)); larger D would silently truncate the depth matrices.
    assert D <= max(H, W), "D must not exceed max(H, W)"
    D2, H2, W2 = D // 2, H // 2, W // 2
    F = H * W

    ml0, ml1, ml2, mh0, mh1, mh2 = build_dwt_matrices(D, H, W)

    # Fuse low/high filters per axis into stacked matrices.
    M0 = np.concatenate([ml0, mh0], axis=0)   # (H, H): rows = [low ; high] (index p)
    M1 = np.concatenate([ml1, mh1], axis=1)   # (W, W): cols = [low | high] (index q)
    M2 = np.concatenate([ml2, mh2], axis=0)   # (D, D): rows = [low ; high] (index r)

    # Fused H+W matrix: K[h*W + w, p*W + q] = M0[p, h] * M1[w, q].
    # 2x for double buffering of the constant block; stay well under scoped VMEM.
    assert 2 * F * F * 4 <= 16 * 1024 * 1024, "fused H/W matrix too large for VMEM"
    K_hw = jnp.asarray(np.kron(M0.T, M1), dtype=jnp.float32)   # (F, F)
    M2j = jnp.asarray(M2, dtype=jnp.float32)                   # (D, D)

    B = N * C
    xb = x.astype(jnp.float32).reshape(B, D, F)   # free reshape (merges H, W)

    # Batch several volumes per grid step; keep x/y blocks ~2 MiB so the
    # default scoped-VMEM limits (v5e 16 MiB, v6e/v7x 32 MiB) are respected
    # even with double-buffered input + output + constant matrices.
    row_bytes = D * F * 4
    if block_rows is None:
        block_rows = max(1, (2 * 1024 * 1024) // max(row_bytes, 1))
    bt = max(1, min(block_rows, B))
    while B % bt:                 # make bt an exact divisor of B (no OOB blocks)
        bt -= 1

    cost = pl.CostEstimate(
        flops=int(2 * B * D * F * F + 2 * B * D * D * F),
        transcendentals=0,
        bytes_accessed=int(4 * (2 * B * D * F + F * F + D * D)),
    )

    y = pl.pallas_call(
        _dwt3d_kernel,
        out_shape=jax.ShapeDtypeStruct((B, D, F), jnp.float32),
        grid_spec=pltpu.PrefetchScalarGridSpec(
            num_scalar_prefetch=0,
            grid=(B // bt,),
            in_specs=[
                pl.BlockSpec((F, F), lambda b: (0, 0)),         # fused H/W matrix
                pl.BlockSpec((D, D), lambda b: (0, 0)),         # stacked depth matrix
                pl.BlockSpec((bt, D, F), lambda b: (b, 0, 0)),  # input rows
            ],
            out_specs=pl.BlockSpec((bt, D, F), lambda b: (b, 0, 0)),
        ),
        compiler_params=pltpu.CompilerParams(
            dimension_semantics=("parallel",)),
        cost_estimate=cost,
    )(K_hw, M2j, xb)

    # Un-flatten and slice the 8 subbands in XLA (cheap; kernel I/O stays lane-dense).
    y5 = y.reshape(N, C, D, H, W)
    return (y5[:, :, :D2, :H2, :W2], y5[:, :, :D2, :H2, W2:],
            y5[:, :, :D2, H2:, :W2], y5[:, :, :D2, H2:, W2:],
            y5[:, :, D2:, :H2, :W2], y5[:, :, D2:, :H2, W2:],
            y5[:, :, D2:, H2:, :W2], y5[:, :, D2:, H2:, W2:])


# ---------------------------------------------------------------------------
# Pure-JAX reference (mirrors DWTFunction_3D.forward exactly) for validation.
# ---------------------------------------------------------------------------
def dwt_3d_ref(x):
    N, C, D, H, W = x.shape
    ml0, ml1, ml2, mh0, mh1, mh2 = [jnp.asarray(m, jnp.float32)
                                    for m in build_dwt_matrices(D, H, W)]
    L = jnp.matmul(ml0, x)
    Hm = jnp.matmul(mh0, x)
    t = lambda a: jnp.swapaxes(a, 2, 3)
    LL = t(jnp.matmul(L, ml1))
    LH = t(jnp.matmul(L, mh1))
    HL = t(jnp.matmul(Hm, ml1))
    HH = t(jnp.matmul(Hm, mh1))
    return (t(jnp.matmul(ml2, LL)), t(jnp.matmul(ml2, LH)),
            t(jnp.matmul(ml2, HL)), t(jnp.matmul(ml2, HH)),
            t(jnp.matmul(mh2, LL)), t(jnp.matmul(mh2, LH)),
            t(jnp.matmul(mh2, HL)), t(jnp.matmul(mh2, HH)))


if __name__ == "__main__":
    key = jax.random.PRNGKey(0)
    N, C, D, H, W = 2, 4, 8, 16, 16
    x = jax.random.normal(key, (N, C, D, H, W), dtype=jnp.float32)

    outs = jax.block_until_ready(dwt_3d(x))

    refs = dwt_3d_ref(x)
    for o, r in zip(outs, refs):
        assert o.shape == (N, C, D // 2, H // 2, W // 2)
        np.testing.assert_allclose(np.asarray(o), np.asarray(r),
                                   rtol=1e-5, atol=2e-5)

    print("KERNEL_OK")
</pallas_src>

<mosaic_0001>
module attributes {stable_mosaic.version = 11 : i64} {
  func.func @_dwt3d_kernel(%arg0: i32, %arg1: memref<256x256xf32, #tpu.memory_space<vmem>>, %arg2: memref<8x8xf32, #tpu.memory_space<vmem>>, %arg3: memref<8x8x256xf32, #tpu.memory_space<vmem>>, %arg4: memref<8x8x256xf32, #tpu.memory_space<vmem>>) attributes {dimension_semantics = [#tpu.dimension_semantics<parallel>], iteration_bounds = array<i64: 1>, scalar_prefetch = 0 : i64, scratch_operands = 0 : i64, tpu.core_type = #tpu.core_type<tc>, window_params = [{pipeline_mode = #tpu.pipeline_mode<synchronous>, transform_indices = @transform_0, window_bounds = array<i64: 256, 256>}, {pipeline_mode = #tpu.pipeline_mode<synchronous>, transform_indices = @transform_1, window_bounds = array<i64: 8, 8>}, {transform_indices = @transform_2, window_bounds = array<i64: 8, 8, 256>}, {transform_indices = @transform_3, window_bounds = array<i64: 8, 8, 256>}]} {
    %c0 = arith.constant 0 : index
    %c0_0 = arith.constant 0 : index
    %c0_1 = arith.constant 0 : index
    %0 = vector.load %arg3[%c0, %c0_0, %c0_1] : memref<8x8x256xf32, #tpu.memory_space<vmem>>, vector<8x8x256xf32>
    %c0_2 = arith.constant 0 : index
    %c0_3 = arith.constant 0 : index
    %1 = vector.load %arg1[%c0_2, %c0_3] : memref<256x256xf32, #tpu.memory_space<vmem>>, vector<256x256xf32>
    "tpu.trace_start"() <{level = 10 : i32, message = "bdf,fg->bdg"}> : () -> ()
    %cst = arith.constant dense<0.000000e+00> : vector<8x8x256xf32>
    %2 = tpu.matmul %0, %1, %cst {dimension_numbers = #tpu.dot_dimension_numbers<[2], [0], [0, 1], [1], [0, 0, 0, 1, 1, 1], [], []>} : vector<8x8x256xf32>, vector<256x256xf32>, vector<8x8x256xf32> -> vector<8x8x256xf32>
    "tpu.trace_stop"() : () -> ()
    %c0_4 = arith.constant 0 : index
    %c0_5 = arith.constant 0 : index
    %3 = vector.load %arg2[%c0_4, %c0_5] : memref<8x8xf32, #tpu.memory_space<vmem>>, vector<8x8xf32>
    "tpu.trace_start"() <{level = 10 : i32, message = "rd,bdf->brf"}> : () -> ()
    %cst_6 = arith.constant dense<0.000000e+00> : vector<8x256x8xf32>
    %4 = tpu.matmul %2, %3, %cst_6 {dimension_numbers = #tpu.dot_dimension_numbers<[1], [1], [0, 2], [0], [0, 0, 0, 2, 1, 0], [], []>} : vector<8x8x256xf32>, vector<8x8xf32>, vector<8x256x8xf32> -> vector<8x256x8xf32>
    %5 = tpu.transpose %4, [0, 2, 1] : vector<8x256x8xf32> -> vector<8x8x256xf32>
    "tpu.trace_stop"() : () -> ()
    %c0_7 = arith.constant 0 : index
    %c0_8 = arith.constant 0 : index
    %c0_9 = arith.constant 0 : index
    %6 = vector.load %arg4[%c0_7, %c0_8, %c0_9] : memref<8x8x256xf32, #tpu.memory_space<vmem>>, vector<8x8x256xf32>
    tpu.vector_store %arg4[%c0_7, %c0_8, %c0_9], %5 {strides = array<i32>} : memref<8x8x256xf32, #tpu.memory_space<vmem>>, vector<8x8x256xf32>,
    return
  }
  func.func @transform_0(%arg0: i32) -> (i32, i32) {
    %c0_i32 = arith.constant 0 : i32
    %c0_i32_0 = arith.constant 0 : i32
    %c0_i32_1 = arith.constant 0 : i32
    return %c0_i32, %c0_i32_0 : i32, i32
  }
  func.func @transform_1(%arg0: i32) -> (i32, i32) {
    %c0_i32 = arith.constant 0 : i32
    %c0_i32_0 = arith.constant 0 : i32
    %c0_i32_1 = arith.constant 0 : i32
    return %c0_i32, %c0_i32_0 : i32, i32
  }
  func.func @transform_2(%arg0: i32) -> (i32, i32, i32) {
    %c0_i32 = arith.constant 0 : i32
    %c0_i32_0 = arith.constant 0 : i32
    %c0_i32_1 = arith.constant 0 : i32
    return %arg0, %c0_i32, %c0_i32_0 : i32, i32, i32
  }
  func.func @transform_3(%arg0: i32) -> (i32, i32, i32) {
    %c0_i32 = arith.constant 0 : i32
    %c0_i32_0 = arith.constant 0 : i32
    %c0_i32_1 = arith.constant 0 : i32
    return %arg0, %c0_i32, %c0_i32_0 : i32, i32, i32
  }
}

</mosaic_0001>

<bundles_post_ra>
// kernel: tpu_custom_call.1
= control target key start
LH: loop header
LB: loop body
LE: loop exit
PB: predicated region body
PF: predicated region fallthrough
CT: control target
= control target key end

     0   :  { %8 = vsyncpa [#allocation3], 0  ;;  %s5839_s0 = inlined_call_operand.hbm [shape: f32[256,256], index: 0, kind: input, shape index: {}]   ;;  %s5840_s1 = inlined_call_operand.hbm [shape: f32[8,8], index: 1, kind: input, shape index: {}]   ;;  %s5841_s2 = inlined_call_operand.hbm [shape: f32[8,8,256], index: 2, kind: input, shape index: {}]   ;;  %s5842_s3 = inlined_call_operand.hbm [shape: f32[8,8,256], index: 3, kind: output, shape index: {}]  }
   0x1   :  { %9 = vsyncpa [#allocation6], 0 }
   0x2   :  { %10 = vsyncpa [#allocation4], 0  ;;  %s4490_s12 = smov [#allocation5]   ;;  %s4491_s14 = smov [#allocation2]  }
   0x3   :  { %s29_s13 = sshll.u32 %s4490_s12, 4  ;;  %s16_s15 = sshll.u32 %s4491_s14, 4  ;;  %s30_s13 = int_to_ptr.vmem [resolvable:$true] %s29_s13  ;;  %s4516_s15 = int_to_ptr.vmem [resolvable:$true] %s16_s15 }
   0x4   :  { %s4396_s18 = scalar_lea.hbm %s5840_s1, 128 }
   0x5   :  { %p4397_p0 = scmp.ne.s32.totalorder %s5840_s1, %s4396_s18  ;;  %p4400_p1 = scmp.lt.u32.totalorder %s4396_s18, %s5840_s1 }
   0x7   :  { %p4402_p2 = pnand %p4400_p1, %p4397_p0 }
   0x9   :  { %4405 = shalt.err (!%p4402_p2)
}
   0xa   :  { %s4406_s23 = scalar_lea.vmem %s30_s13, 128  ;;  %p4411_p4 = scmp.lt.s32.totalorder %s30_s13, %s30_s13 }
   0xb   :  { %p4407_p3 = scmp.ne.s32.totalorder %s30_s13, %s4406_s23  ;;  %p4412_p5 = scmp.lt.s32.totalorder %s4406_s23, %s4406_s23 }
   0xd   :  { %p4413_p6 = por %p4412_p5, %p4411_p4 }
   0xf   :  { %p4414_p7 = pnand %p4413_p6, %p4407_p3 }
  0x11   :  { %4417 = shalt.err (!%p4414_p7)
}
  0x12   :  { %32 = dma.hbm_to_vmem [thread:$0]  %s5840_s1, 128, %s30_s13, [#allocation6]  }
  0x13   :  { %s4418_s28 = scalar_lea.hbm %s5839_s0, 8192 }
  0x14   :  { %p4419_p8 = scmp.ne.s32.totalorder %s5839_s0, %s4418_s28  ;;  %p4422_p9 = scmp.lt.u32.totalorder %s4418_s28, %s5839_s0 }
  0x16   :  { %p4424_p10 = pnand %p4422_p9, %p4419_p8 }
  0x18   :  { %4427 = shalt.err (!%p4424_p10)
}
  0x19   :  { %s4428_s6 = scalar_lea.vmem %s4516_s15, 8192  ;;  %p4433_p12 = scmp.lt.s32.totalorder %s4516_s15, %s4516_s15 }
  0x1a   :  { %p4429_p11 = scmp.ne.s32.totalorder %s4516_s15, %s4428_s6  ;;  %p4434_p13 = scmp.lt.s32.totalorder %s4428_s6, %s4428_s6 }
  0x1c   :  { %p4435_p0 = por %p4434_p13, %p4433_p12 }
  0x1e   :  { %p4436_p1 = pnand %p4435_p0, %p4429_p11 }
  0x20   :  { %4439 = shalt.err (!%p4436_p1)
}
  0x21   :  { %s4492_s1 = smov 256   ;;  %s4493_s7 = smov 16  }
  0x22   :  { %22 = dma.hbm_to_vmem [thread:$0]  %s5839_s0, 8192, %s4516_s15, [#allocation3], %s4492_s1, %s4492_s1, %s4493_s7  }
  0x23   :  { %s4494_s10 = smov [#allocation7]   ;;  %s4440_s14 = scalar_lea.hbm %s5841_s2, 2048 }
  0x24   :  { %s38_s11 = sshll.u32 %s4494_s10, 4  ;;  %p4441_p2 = scmp.ne.s32.totalorder %s5841_s2, %s4440_s14  ;;  %s39_s11 = int_to_ptr.vmem [resolvable:$true] %s38_s11 }
  0x25   :  { %p4444_p3 = scmp.lt.u32.totalorder %s4440_s14, %s5841_s2 }
  0x27   :  { %p4446_p4 = pnand %p4444_p3, %p4441_p2 }
  0x29   :  { %4449 = shalt.err (!%p4446_p4)
}
  0x2a   :  { %s4450_s20 = scalar_lea.vmem %s39_s11, 2048  ;;  %p4455_p6 = scmp.lt.s32.totalorder %s39_s11, %s39_s11 }
  0x2b   :  { %p4451_p5 = scmp.ne.s32.totalorder %s39_s11, %s4450_s20  ;;  %p4456_p7 = scmp.lt.s32.totalorder %s4450_s20, %s4450_s20 }
  0x2d   :  { %p4457_p8 = por %p4456_p7, %p4455_p6 }
  0x2f   :  { %p4458_p9 = pnand %p4457_p8, %p4451_p5 }
  0x31   :  { %4461 = shalt.err (!%p4458_p9)
}
  0x32   :  { %44 = dma.hbm_to_vmem [thread:$0]  %s5841_s2, 2048, %s39_s11, [#allocation6], %s4492_s1, %s4492_s1, %s4493_s7  }
  0x33   :  { %4484 = dma.done.wait [#allocation3], 8192  }
  0x34   :  { %4485 = vsyncadd [#allocation3], 4294959104 }
  0x35   :  { %4486 = dma.done.wait [#allocation6], 2176  }
  0x36   :  { %4487 = vsyncadd [#allocation6], 4294965120  ;;  %v71_v0 = vld [vmem:[#allocation2 + $0x8] sm:$0xff]  ;;  %v73_v1 = vld [vmem:[#allocation2 + $0x18] sm:$0xff]  ;;  %vm760_vm0 = vcmask 64512   ;;  %s4495_s2 = smov [#allocation8]  }
  0x37   :  { %v70_v2 = vld [vmem:[#allocation2] sm:$0xff]  ;;  %v4323_v3 = vpack.c.bf16 %v73_v1, %v71_v0  ;;  %v72_v4 = vld [vmem:[#allocation2 + $0x10] sm:$0xff]  ;;  %v75_v5 = vld [vmem:[#allocation2 + $0x28] sm:$0xff]  ;;  %s3410_s21 = sshll.u32 %s4495_s2, 4  ;;  %s3411_s21 = int_to_ptr.vmem [resolvable:$true] %s3410_s21 }
  0x38   :  { %v77_v6 = vld [vmem:[#allocation2 + $0x38] sm:$0xff]  ;;  %v4325_v7 = vpack.c.bf16 %v72_v4, %v70_v2  ;;  %v74_v9 = vld [vmem:[#allocation2 + $0x20] sm:$0xff]  ;;  %v76_v10 = vld [vmem:[#allocation2 + $0x30] sm:$0xff]  ;;  %s4462_s22 = scalar_lea.vmem %s3411_s21, 2048  ;;  %p4467_p11 = scmp.lt.s32.totalorder %s3411_s21, %s3411_s21 }
  0x39   :  { %v4327_v8 = vpack.c.bf16 %v77_v6, %v75_v5  ;;  %v79_v11 = vld [vmem:[#allocation2 + $0x48] sm:$0xff]  ;;  %4324 = vmatprep.subr.bf16.mxu0 %v4323_v3  ;;  %v81_v12 = vld [vmem:[#allocation2 + $0x58] sm:$0xff]  ;;  %v4329_v13 = vpack.c.bf16 %v76_v10, %v74_v9  ;;  %v78_v15 = vld [vmem:[#allocation2 + $0x40] sm:$0xff]  ;;  %p4463_p10 = scmp.ne.s32.totalorder %s3411_s21, %s4462_s22  ;;  %p4468_p12 = scmp.lt.s32.totalorder %s4462_s22, %s4462_s22 }
  0x3a   :  { %4326 = vmatpush1.bf16.msra.mxu0 %v4325_v7  ;;  %v4331_v14 = vpack.c.bf16 %v81_v12, %v79_v11  ;;  %v80_v16 = vld [vmem:[#allocation2 + $0x50] sm:$0xff]  ;;  %v83_v17 = vld [vmem:[#allocation2 + $0x68] sm:$0xff]  ;;  %v85_v18 = vld [vmem:[#allocation2 + $0x78] sm:$0xff] }
  0x3b   :  { %4328 = vmatprep.subr.bf16.mxu0 %v4327_v8  ;;  %v4333_v19 = vpack.c.bf16 %v80_v16, %v78_v15  ;;  %v4335_v20 = vpack.c.bf16 %v85_v18, %v83_v17  ;;  %v82_v21 = vld [vmem:[#allocation2 + $0x60] sm:$0xff]  ;;  %v84_v22 = vld [vmem:[#allocation2 + $0x70] sm:$0xff]  ;;  %v87_v23 = vld [vmem:[#allocation2 + $0x88] sm:$0xff]  ;;  %p4469_p13 = por %p4468_p12, %p4467_p11 }
  0x3c   :  { %v89_v24 = vld [vmem:[#allocation2 + $0x98] sm:$0xff]  ;;  %v4337_v25 = vpack.c.bf16 %v84_v22, %v82_v21  ;;  %v86_v27 = vld [vmem:[#allocation2 + $0x80] sm:$0xff]  ;;  %v88_v28 = vld [vmem:[#allocation2 + $0x90] sm:$0xff] }
  0x3d   :  { %v4339_v26 = vpack.c.bf16 %v89_v24, %v87_v23  ;;  %v91_v29 = vld [vmem:[#allocation2 + $0xa8] sm:$0xff]  ;;  %v93_v30 = vld [vmem:[#allocation2 + $0xb8] sm:$0xff]  ;;  %v4341_v31 = vpack.c.bf16 %v88_v28, %v86_v27  ;;  %v90_v33 = vld [vmem:[#allocation2 + $0xa0] sm:$0xff]  ;;  %p4470_p0 = pnand %p4469_p13, %p4463_p10 }
  0x3e   :  { %4330 = vmatpush1.bf16.msra.mxu0 %v4329_v13  ;;  %v4343_v32 = vpack.c.bf16 %v93_v30, %v91_v29  ;;  %v92_v34 = vld [vmem:[#allocation2 + $0xb0] sm:$0xff]  ;;  %v95_v35 = vld [vmem:[#allocation2 + $0xc8] sm:$0xff]  ;;  %v97_v36 = vld [vmem:[#allocation2 + $0xd8] sm:$0xff] }
  0x3f   :  { %4332 = vmatprep.subr.bf16.mxu0 %v4331_v14  ;;  %v4345_v37 = vpack.c.bf16 %v92_v34, %v90_v33  ;;  %v4347_v38 = vpack.c.bf16 %v97_v36, %v95_v35  ;;  %v94_v39 = vld [vmem:[#allocation2 + $0xc0] sm:$0xff]  ;;  %v96_v40 = vld [vmem:[#allocation2 + $0xd0] sm:$0xff]  ;;  %v99_v42 = vld [vmem:[#allocation2 + $0xe8] sm:$0xff] }
  0x40   :  { %v55_v41 = vld [vmem:[#allocation7 + $0x8] sm:$0xff]  ;;  %v101_v43 = vld [vmem:[#allocation2 + $0xf8] sm:$0xff]  ;;  %v4349_v44 = vpack.c.bf16 %v96_v40, %v94_v39  ;;  %v98_v46 = vld [vmem:[#allocation2 + $0xe0] sm:$0xff] }
  0x41   :  { %198 = vmatprep.mubr.f32.mxu0 %v55_v41  ;;  %v4351_v45 = vpack.c.bf16 %v101_v43, %v99_v42  ;;  %v100_v47 = vld [vmem:[#allocation2 + $0xf0] sm:$0xff]  ;;  %v103_v48 = vld [vmem:[#allocation2 + $0x108] sm:$0xff]  ;;  %v105_v49 = vld [vmem:[#allocation2 + $0x118] sm:$0xff] }
  0x42   :  { %4334 = vmatpush1.bf16.msra.mxu0 %v4333_v19  ;;  %v4353_v50 = vpack.c.bf16 %v100_v47, %v98_v46  ;;  %v4355_v51 = vpack.c.bf16 %v105_v49, %v103_v48  ;;  %v102_v52 = vld [vmem:[#allocation2 + $0x100] sm:$0xff]  ;;  %v104_v53 = vld [vmem:[#allocation2 + $0x110] sm:$0xff]  ;;  %v107_v54 = vld [vmem:[#allocation2 + $0x128] sm:$0xff] }
  0x43   :  { %4336 = vmatprep.subr.bf16.mxu0 %v4335_v20  ;;  %v109_v55 = vld [vmem:[#allocation2 + $0x138] sm:$0xff]  ;;  %v4357_v56 = vpack.c.bf16 %v104_v53, %v102_v52  ;;  %v106_v58 = vld [vmem:[#allocation2 + $0x120] sm:$0xff]  ;;  %v108_v59 = vld [vmem:[#allocation2 + $0x130] sm:$0xff] }
  0x44   :  { %v4359_v57 = vpack.c.bf16 %v109_v55, %v107_v54  ;;  %v111_v60 = vld [vmem:[#allocation2 + $0x148] sm:$0xff]  ;;  %v113_v61 = vld [vmem:[#allocation2 + $0x158] sm:$0xff]  ;;  %v4361_v62 = vpack.c.bf16 %v108_v59, %v106_v58  ;;  %v110_v0 = vld [vmem:[#allocation2 + $0x140] sm:$0xff] }
  0x45   :  { %v4363_v63 = vpack.c.bf16 %v113_v61, %v111_v60  ;;  %v112_v1 = vld [vmem:[#allocation2 + $0x150] sm:$0xff]  ;;  %v115_v2 = vld [vmem:[#allocation2 + $0x168] sm:$0xff]  ;;  %v117_v3 = vld [vmem:[#allocation2 + $0x178] sm:$0xff] }
  0x46   :  { %4338 = vmatpush1.bf16.msra.mxu0 %v4337_v25  ;;  %v4365_v4 = vpack.c.bf16 %v112_v1, %v110_v0  ;;  %v4367_v5 = vpack.c.bf16 %v117_v3, %v115_v2  ;;  %v114_v6 = vld [vmem:[#allocation2 + $0x160] sm:$0xff]  ;;  %v116_v7 = vld [vmem:[#allocation2 + $0x170] sm:$0xff]  ;;  %v119_v8 = vld [vmem:[#allocation2 + $0x188] sm:$0xff] }
  0x47   :  { %4340 = vmatprep.subr.bf16.mxu0 %v4339_v26  ;;  %v121_v9 = vld [vmem:[#allocation2 + $0x198] sm:$0xff]  ;;  %v4369_v10 = vpack.c.bf16 %v116_v7, %v114_v6  ;;  %v118_v12 = vld [vmem:[#allocation2 + $0x180] sm:$0xff]  ;;  %v120_v13 = vld [vmem:[#allocation2 + $0x190] sm:$0xff] }
  0x48   :  { %v4371_v11 = vpack.c.bf16 %v121_v9, %v119_v8  ;;  %v123_v14 = vld [vmem:[#allocation2 + $0x1a8] sm:$0xff]  ;;  %v125_v15 = vld [vmem:[#allocation2 + $0x1b8] sm:$0xff]  ;;  %v4373_v16 = vpack.c.bf16 %v120_v13, %v118_v12  ;;  %v122_v18 = vld [vmem:[#allocation2 + $0x1a0] sm:$0xff] }
  0x49   :  { %v4375_v17 = vpack.c.bf16 %v125_v15, %v123_v14  ;;  %v124_v19 = vld [vmem:[#allocation2 + $0x1b0] sm:$0xff]  ;;  %v127_v20 = vld [vmem:[#allocation2 + $0x1c8] sm:$0xff]  ;;  %v129_v21 = vld [vmem:[#allocation2 + $0x1d8] sm:$0xff] }
  0x4a   :  { %4342 = vmatpush1.bf16.msra.mxu0 %v4341_v31  ;;  %v4377_v22 = vpack.c.bf16 %v124_v19, %v122_v18  ;;  %v4379_v23 = vpack.c.bf16 %v129_v21, %v127_v20  ;;  %v126_v24 = vld [vmem:[#allocation2 + $0x1c0] sm:$0xff]  ;;  %v128_v25 = vld [vmem:[#allocation2 + $0x1d0] sm:$0xff]  ;;  %v131_v26 = vld [vmem:[#allocation2 + $0x1e8] sm:$0xff] }
  0x4b   :  { %4344 = vmatprep.subr.bf16.mxu0 %v4343_v32  ;;  %v133_v27 = vld [vmem:[#allocation2 + $0x1f8] sm:$0xff]  ;;  %v4381_v28 = vpack.c.bf16 %v128_v25, %v126_v24  ;;  %v130_v30 = vld [vmem:[#allocation2 + $0x1e0] sm:$0xff]  ;;  %v132_v31 = vld [vmem:[#allocation2 + $0x1f0] sm:$0xff] }
  0x4c   :  { %v4383_v29 = vpack.c.bf16 %v133_v27, %v131_v26  ;;  %v4385_v32 = vpack.c.bf16 %v132_v31, %v130_v30  ;;  %v54_v33 = vld [vmem:[#allocation7] sm:$0xff]  ;;  %v57_v34 = vld [vmem:[#allocation7 + $0x18] sm:$0xff]  ;;  %v56_v35 = vld [vmem:[#allocation7 + $0x10] sm:$0xff] }
  0x4d   :  { %v59_v36 = vld [vmem:[#allocation7 + $0x28] sm:$0xff]  ;;  %v60_v39 = vld [vmem:[#allocation7 + $0x30] sm:$0xff]  ;;  %v62_v41 = vld [vmem:[#allocation7 + $0x40] sm:$0xff] }
  0x4e   :  { %4346 = vmatpush1.bf16.msra.mxu0 %v4345_v37  ;;  %v58_v37 = vld [vmem:[#allocation7 + $0x20] sm:$0xff]  ;;  %v63_v40 = vld [vmem:[#allocation7 + $0x48] sm:$0xff]  ;;  %v65_v42 = vld [vmem:[#allocation7 + $0x58] sm:$0xff] }
  0x4f   :  { %4348 = vmatprep.subr.bf16.mxu0 %v4347_v38  ;;  %v61_v38 = vld [vmem:[#allocation7 + $0x38] sm:$0xff]  ;;  %v64_v43 = vld [vmem:[#allocation7 + $0x50] sm:$0xff] }
  0x50   :  { %v69_v46 = vld [vmem:[#allocation7 + $0x78] sm:$0xff]  ;;  %v68_v47 = vld [vmem:[#allocation7 + $0x70] sm:$0xff] }
  0x52   :  { %4350 = vmatpush1.bf16.msra.mxu0 %v4349_v44  ;;  %v67_v44 = vld [vmem:[#allocation7 + $0x68] sm:$0xff] }
  0x53   :  { %4352 = vmatprep.subr.bf16.mxu0 %v4351_v45  ;;  %v66_v45 = vld [vmem:[#allocation7 + $0x60] sm:$0xff] }
  0x56   :  { %4354 = vmatpush1.bf16.msra.mxu0 %v4353_v50  ;;  %v247_v50 = vld [vmem:[#allocation5] sm:$0xff] }
  0x57   :  { %4356 = vmatprep.subr.bf16.mxu0 %v4355_v51  ;;  %4387 = vmatprep.subr.msk.mxu1 %vm760_vm0, %v247_v50 }
  0x58   :  { %4388 = vmatpush3.xpose.msk.msra.mxu1 %vm760_vm0, %v247_v50 }
  0x5a   :  { %4358 = vmatpush1.bf16.msra.mxu0 %v4357_v56 }
  0x5b   :  { %4360 = vmatprep.subr.bf16.mxu0 %v4359_v57 }
  0x5e   :  { %4362 = vmatpush1.bf16.msra.mxu0 %v4361_v62 }
  0x5f   :  { %4364 = vmatprep.subr.bf16.mxu0 %v4363_v63 }
  0x62   :  { %4366 = vmatpush1.bf16.msra.mxu0 %v4365_v4 }
  0x63   :  { %4368 = vmatprep.subr.bf16.mxu0 %v4367_v5 }
  0x66   :  { %4370 = vmatpush1.bf16.msra.mxu0 %v4369_v10 }
  0x67   :  { %4372 = vmatprep.subr.bf16.mxu0 %v4371_v11 }
  0x6a   :  { %4374 = vmatpush1.bf16.msra.mxu0 %v4373_v16 }
  0x6b   :  { %4376 = vmatprep.subr.bf16.mxu0 %v4375_v17 }
  0x6e   :  { %4378 = vmatpush1.bf16.msra.mxu0 %v4377_v22 }
  0x6f   :  { %4380 = vmatprep.subr.bf16.mxu0 %v4379_v23 }
  0x72   :  { %4382 = vmatpush1.bf16.msra.mxu0 %v4381_v28 }
  0x73   :  { %4384 = vmatprep.subr.bf16.mxu0 %v4383_v29 }
  0x76   :  { %4386 = vmatpush1.bf16.msra.mxu0 %v4385_v32 }
  0x77   :  { %3937 = vmatprep.subr.msk.mxu0 %vm760_vm0, %v247_v50 }
  0x79   :  { %199 = vmatmul.mubr.f32.vlgmr.msra.gmra.mrb[0].mxu0 %v54_v33 }
  0x7a   :  { %204 = vmatprep.mubr.f32.mxu0 %v57_v34 }
  0x7d   :  { %205 = vmatmul.mubr.f32.gmra.mrb[2].mxu0 %v56_v35 }
  0x7e   :  { %210 = vmatprep.mubr.f32.mxu0 %v59_v36 }
  0x7f   :  { %3938 = vmatpush3.xpose.msk.msra.mxu0 %vm760_vm0, %v247_v50 }
  0x81   :  { %211 = vmatmul.mubr.f32.gmra.mrb[4].mxu0 %v58_v37 }
  0x82   :  { %216 = vmatprep.mubr.f32.mxu0 %v61_v38 }
  0x85   :  { %217 = vmatmul.mubr.f32.gmra.mrb[6].mxu0 %v60_v39 }
  0x86   :  { %222 = vmatprep.mubr.f32.mxu0 %v63_v40 }
  0x89   :  { %223 = vmatmul.mubr.f32.gmra.mrb[8].mxu0 %v62_v41 }
  0x8a   :  { %228 = vmatprep.mubr.f32.mxu0 %v65_v42 }
  0x8d   :  { %229 = vmatmul.mubr.f32.gmra.mrb[10].mxu0 %v64_v43 }
  0x8e   :  { %234 = vmatprep.mubr.f32.mxu0 %v67_v44 }
  0x91   :  { %235 = vmatmul.mubr.f32.gmra.mrb[12].mxu0 %v66_v45 }
  0x92   :  { %240 = vmatprep.mubr.f32.mxu0 %v69_v46 }
  0x95   :  { %241 = vmatmul.mubr.f32.gmra.mrb[14].mxu0 %v68_v47 }
 0x14c   :  { %v200_v48 = vpop.f32.mrb[0].mxu0 }
 0x14d   :  { %248 = vxpose.xlu0.b32.start.end [1/1] (short) %v200_v48, 128  ;;  %v202_v49 = vpop.f32.mrb[1].mxu0 }
 0x150   :  { %v206_v51 = vpop.f32.mrb[2].mxu0 }
 0x151   :  { %312 = vxpose.xlu1.b32.start.end [1/1] (short) %v206_v51, 128  ;;  %v208_v52 = vpop.f32.mrb[3].mxu0 }
 0x154   :  { %v212_v53 = vpop.f32.mrb[4].mxu0 }
 0x155   :  { %v214_v54 = vpop.f32.mrb[5].mxu0 }
 0x158   :  { %v218_v55 = vpop.f32.mrb[6].mxu0 }
 0x159   :  { %v220_v56 = vpop.f32.mrb[7].mxu0 }
 0x15c   :  { %v4569_v57 = vpop.f32.mrb[8].mxu0 }
 0x15d   :  { %v4572_v59 = vpop.f32.mrb[9].mxu0 }
 0x160   :  { %v4619_v26 = vpop.f32.mrb[10].mxu0 }
 0x161   :  { %v4624_v29 = vpop.f32.mrb[11].mxu0 }
 0x164   :  { %v4641_v40 = vpop.f32.mrb[12].mxu0 }
 0x165   :  { %v4643_v41 = vpop.f32.mrb[13].mxu0 }
 0x168   :  { %v4645_v42 = vpop.f32.mrb[14].mxu0 }
 0x169   :  { %v4650_v45 = vpop.f32.mrb[15].mxu0 }
 0x18a   :  { %280 = vxpose.xlu0.b32.start.end [1/1] (short) %v202_v49, 128 }
 0x18e   :  { %344 = vxpose.xlu1.b32.start.end [1/1] (short) %v208_v52, 128 }
 0x1c7   :  { %376 = vxpose.xlu0.b32.start.end [1/1] (short) %v212_v53, 128 }
 0x1cb   :  { %408 = vxpose.xlu1.b32.start.end [1/1] (short) %v214_v54, 128 }
 0x1cd   :  { %v264_v58 = vpop.trf.xlu0 }
 0x1ce   :  { %3939 = vmatprep.mubr.msk.f32.mxu0 %vm760_vm0, %v264_v58 }
 0x1d1   :  { %v265_v60 = vpop.trf.xlu0  ;;  %v4574_v61 = vpop.trf.xlu1 }
 0x1d2   :  { %3940 = vmatmul.mubr.msk.f32.vlgmr.msra.gmra.mrb[16].mxu0 %vm760_vm0, %v265_v60 }
 0x1d5   :  { %v266_v62 = vpop.trf.xlu0  ;;  %v4577_v63 = vpop.trf.xlu1 }
 0x1d6   :  { %3942 = vmatprep.mubr.msk.f32.mxu0 %vm760_vm0, %v266_v62 }
 0x1d9   :  { %v267_v0 = vpop.trf.xlu0  ;;  %v4580_v1 = vpop.trf.xlu1 }
 0x1da   :  { %3943 = vmatmul.mubr.msk.f32.gmra.mrb[18].mxu0 %vm760_vm0, %v267_v0 }
 0x1dd   :  { %v268_v2 = vpop.trf.xlu0  ;;  %v4583_v3 = vpop.trf.xlu1 }
 0x1de   :  { %3945 = vmatprep.mubr.msk.f32.mxu0 %vm760_vm0, %v268_v2 }
 0x1e1   :  { %v269_v4 = vpop.trf.xlu0  ;;  %v4586_v5 = vpop.trf.xlu1 }
 0x1e2   :  { %3946 = vmatmul.mubr.msk.f32.gmra.mrb[20].mxu0 %vm760_vm0, %v269_v4 }
 0x1e5   :  { %v270_v6 = vpop.trf.xlu0  ;;  %v4589_v7 = vpop.trf.xlu1 }
 0x1e6   :  { %3948 = vmatprep.mubr.msk.f32.mxu0 %vm760_vm0, %v270_v6 }
 0x1e9   :  { %v271_v8 = vpop.trf.xlu0  ;;  %v4592_v9 = vpop.trf.xlu1 }
 0x1ea   :  { %3949 = vmatmul.mubr.msk.f32.gmra.mrb[22].mxu0 %vm760_vm0, %v271_v8 }
 0x1ed   :  { %v272_v10 = vpop.trf.xlu0  ;;  %v4595_v11 = vpop.trf.xlu1 }
 0x1ee   :  { %3951 = vmatprep.mubr.msk.f32.mxu0 %vm760_vm0, %v272_v10 }
 0x1f1   :  { %v273_v12 = vpop.trf.xlu0  ;;  %v4598_v13 = vpop.trf.xlu1 }
 0x1f2   :  { %3952 = vmatmul.mubr.msk.f32.gmra.mrb[24].mxu0 %vm760_vm0, %v273_v12 }
 0x1f5   :  { %v274_v14 = vpop.trf.xlu0  ;;  %v4601_v15 = vpop.trf.xlu1 }
 0x1f6   :  { %3954 = vmatprep.mubr.msk.f32.mxu0 %vm760_vm0, %v274_v14 }
 0x1f9   :  { %v275_v16 = vpop.trf.xlu0  ;;  %v4604_v17 = vpop.trf.xlu1 }
 0x1fa   :  { %3955 = vmatmul.mubr.msk.f32.gmra.mrb[26].mxu0 %vm760_vm0, %v275_v16 }
 0x1fd   :  { %v276_v18 = vpop.trf.xlu0  ;;  %v4607_v19 = vpop.trf.xlu1 }
 0x1fe   :  { %3957 = vmatprep.mubr.msk.f32.mxu0 %vm760_vm0, %v276_v18 }
 0x201   :  { %v277_v20 = vpop.trf.xlu0  ;;  %v4610_v21 = vpop.trf.xlu1 }
 0x202   :  { %3958 = vmatmul.mubr.msk.f32.gmra.mrb[28].mxu0 %vm760_vm0, %v277_v20 }
 0x205   :  { %v278_v22 = vpop.trf.xlu0  ;;  %v4613_v23 = vpop.trf.xlu1  ;;  %440 = vxpose.xlu0.b32.start.end [1/1] (short) %v218_v55, 128 }
 0x206   :  { %3960 = vmatprep.mubr.msk.f32.mxu0 %vm760_vm0, %v278_v22 }
 0x209   :  { %v279_v24 = vpop.trf.xlu0  ;;  %v4616_v25 = vpop.trf.xlu1  ;;  %472 = vxpose.xlu1.b32.start.end [1/1] (short) %v220_v56, 128 }
 0x20a   :  { %3961 = vmatmul.mubr.msk.f32.gmra.mrb[30].mxu0 %vm760_vm0, %v279_v24 }
 0x20d   :  { %v296_v27 = vpop.trf.xlu0  ;;  %v4621_v28 = vpop.trf.xlu1 }
 0x20e   :  { %3963 = vmatprep.mubr.msk.f32.mxu0 %vm760_vm0, %v296_v27 }
 0x211   :  { %v297_v30 = vpop.trf.xlu0  ;;  %v4626_v31 = vpop.trf.xlu1 }
 0x212   :  { %3964 = vmatmul.mubr.msk.f32.gmra.mrb[32].mxu0 %vm760_vm0, %v297_v30 }
 0x215   :  { %v298_v32 = vpop.trf.xlu0  ;;  %v4629_v33 = vpop.trf.xlu1 }
 0x216   :  { %3966 = vmatprep.mubr.msk.f32.mxu0 %vm760_vm0, %v298_v32 }
 0x219   :  { %v299_v34 = vpop.trf.xlu0  ;;  %v4632_v35 = vpop.trf.xlu1 }
 0x21a   :  { %3967 = vmatmul.mubr.msk.f32.gmra.mrb[34].mxu0 %vm760_vm0, %v299_v34 }
 0x21d   :  { %v300_v36 = vpop.trf.xlu0  ;;  %v4635_v37 = vpop.trf.xlu1 }
 0x21e   :  { %3969 = vmatprep.mubr.msk.f32.mxu0 %vm760_vm0, %v300_v36 }
 0x221   :  { %v301_v38 = vpop.trf.xlu0  ;;  %v4638_v39 = vpop.trf.xlu1 }
 0x222   :  { %3970 = vmatmul.mubr.msk.f32.gmra.mrb[36].mxu0 %vm760_vm0, %v301_v38 }
 0x225   :  { %v302_v43 = vpop.trf.xlu0  ;;  %v4647_v44 = vpop.trf.xlu1 }
 0x226   :  { %3972 = vmatprep.mubr.msk.f32.mxu0 %vm760_vm0, %v302_v43 }
 0x229   :  { %v303_v46 = vpop.trf.xlu0  ;;  %v4652_v47 = vpop.trf.xlu1 }
 0x22a   :  { %3973 = vmatmul.mubr.msk.f32.gmra.mrb[38].mxu0 %vm760_vm0, %v303_v46 }
 0x22d   :  { %v304_v48 = vpop.trf.xlu0  ;;  %v4655_v49 = vpop.trf.xlu1 }
 0x22e   :  { %3975 = vmatprep.mubr.msk.f32.mxu0 %vm760_vm0, %v304_v48 }
 0x231   :  { %v305_v50 = vpop.trf.xlu0  ;;  %v4658_v51 = vpop.trf.xlu1 }
 0x232   :  { %3976 = vmatmul.mubr.msk.f32.gmra.mrb[40].mxu0 %vm760_vm0, %v305_v50 }
 0x235   :  { %v306_v52 = vpop.trf.xlu0  ;;  %v4661_v53 = vpop.trf.xlu1 }
 0x236   :  { %3978 = vmatprep.mubr.msk.f32.mxu0 %vm760_vm0, %v306_v52 }
 0x239   :  { %v307_v54 = vpop.trf.xlu0  ;;  %v4664_v55 = vpop.trf.xlu1 }
 0x23a   :  { %3979 = vmatmul.mubr.msk.f32.gmra.mrb[42].mxu0 %vm760_vm0, %v307_v54 }
 0x23d   :  { %v308_v56 = vpop.trf.xlu0  ;;  %v4667_v58 = vpop.trf.xlu1 }
 0x23e   :  { %3981 = vmatprep.mubr.msk.f32.mxu0 %vm760_vm0, %v308_v56 }
 0x241   :  { %v309_v60 = vpop.trf.xlu0  ;;  %v4670_v62 = vpop.trf.xlu1 }
 0x242   :  { %3982 = vmatmul.mubr.msk.f32.gmra.mrb[44].mxu0 %vm760_vm0, %v309_v60 }
 0x245   :  { %v310_v0 = vpop.trf.xlu0  ;;  %v4673_v2 = vpop.trf.xlu1  ;;  %504 = vxpose.xlu0.b32.start.end [1/1] (short) %v4569_v57, 128 }
 0x246   :  { %3984 = vmatprep.mubr.msk.f32.mxu0 %vm760_vm0, %v310_v0 }
 0x249   :  { %v311_v4 = vpop.trf.xlu0  ;;  %v4677_v6 = vpop.trf.xlu1  ;;  %536 = vxpose.xlu1.b32.start.end [1/1] (short) %v4572_v59, 128 }
 0x24a   :  { %3985 = vmatmul.mubr.msk.f32.gmra.mrb[46].mxu0 %vm760_vm0, %v311_v4 }
 0x24b   :  { %3987 = vmatprep.mubr.msk.f32.mxu0 %vm760_vm0, %v4574_v61 }
 0x24d   :  { %v4683_v8 = vpop.trf.xlu1  ;;  %v4685_v10 = vpop.trf.xlu0 }
 0x24e   :  { %3988 = vmatmul.mubr.msk.f32.gmra.mrb[48].mxu0 %vm760_vm0, %v4577_v63 }
 0x24f   :  { %3990 = vmatprep.mubr.msk.f32.mxu0 %vm760_vm0, %v4580_v1 }
 0x251   :  { %v4691_v57 = vpop.trf.xlu0  ;;  %v4693_v12 = vpop.trf.xlu1 }
 0x252   :  { %3991 = vmatmul.mubr.msk.f32.gmra.mrb[50].mxu0 %vm760_vm0, %v4583_v3 }
 0x253   :  { %3993 = vmatprep.mubr.msk.f32.mxu0 %vm760_vm0, %v4586_v5 }
 0x255   :  { %v394_v59 = vpop.trf.xlu0  ;;  %v4699_v61 = vpop.trf.xlu1 }
 0x256   :  { %3994 = vmatmul.mubr.msk.f32.gmra.mrb[52].mxu0 %vm760_vm0, %v4589_v7 }
 0x257   :  { %3996 = vmatprep.mubr.msk.f32.mxu0 %vm760_vm0, %v4592_v9 }
 0x259   :  { %v395_v63 = vpop.trf.xlu0  ;;  %v4705_v1 = vpop.trf.xlu1 }
 0x25a   :  { %3997 = vmatmul.mubr.msk.f32.gmra.mrb[54].mxu0 %vm760_vm0, %v4595_v11 }
 0x25b   :  { %3999 = vmatprep.mubr.msk.f32.mxu0 %vm760_vm0, %v4598_v13 }
 0x25d   :  { %v396_v3 = vpop.trf.xlu0  ;;  %v4711_v5 = vpop.trf.xlu1 }
 0x25e   :  { %4000 = vmatmul.mubr.msk.f32.gmra.mrb[56].mxu0 %vm760_vm0, %v4601_v15 }
 0x25f   :  { %4002 = vmatprep.mubr.msk.f32.mxu0 %vm760_vm0, %v4604_v17 }
 0x261   :  { %v397_v7 = vpop.trf.xlu0  ;;  %v4717_v9 = vpop.trf.xlu1 }
 0x262   :  { %4003 = vmatmul.mubr.msk.f32.gmra.mrb[58].mxu0 %vm760_vm0, %v4607_v19 }
 0x263   :  { %4005 = vmatprep.mubr.msk.f32.mxu0 %vm760_vm0, %v4610_v21 }
 0x265   :  { %v398_v11 = vpop.trf.xlu0  ;;  %v4723_v13 = vpop.trf.xlu1 }
 0x266   :  { %4006 = vmatmul.mubr.msk.f32.gmra.mrb[60].mxu0 %vm760_vm0, %v4613_v23 }
 0x267   :  { %4008 = vmatprep.mubr.msk.f32.mxu0 %vm760_vm0, %v4616_v25 }
 0x269   :  { %v399_v14 = vpop.trf.xlu0  ;;  %v4729_v15 = vpop.trf.xlu1 }
 0x26a   :  { %4009 = vmatmul.mubr.msk.f32.gmra.mrb[62].mxu0 %vm760_vm0, %v4621_v28 }
 0x26b   :  { %4011 = vmatprep.mubr.msk.f32.mxu0 %vm760_vm0, %v4626_v31 }
 0x26d   :  { %v400_v16 = vpop.trf.xlu0  ;;  %v4735_v17 = vpop.trf.xlu1 }
 0x26e   :  { %4012 = vmatmul.mubr.msk.f32.gmra.mrb[64].mxu0 %vm760_vm0, %v4629_v33 }
 0x26f   :  { %4014 = vmatprep.mubr.msk.f32.mxu0 %vm760_vm0, %v4632_v35 }
 0x271   :  { %v401_v18 = vpop.trf.xlu0  ;;  %v4741_v19 = vpop.trf.xlu1 }
 0x272   :  { %4015 = vmatmul.mubr.msk.f32.gmra.mrb[66].mxu0 %vm760_vm0, %v4635_v37 }
 0x273   :  { %4017 = vmatprep.mubr.msk.f32.mxu0 %vm760_vm0, %v4638_v39 }
 0x275   :  { %v402_v20 = vpop.trf.xlu0  ;;  %v4747_v21 = vpop.trf.xlu1 }
 0x276   :  { %4018 = vmatmul.mubr.msk.f32.gmra.mrb[68].mxu0 %vm760_vm0, %v4647_v44 }
 0x277   :  { %4020 = vmatprep.mubr.msk.f32.mxu0 %vm760_vm0, %v4652_v47 }
 0x279   :  { %v403_v22 = vpop.trf.xlu0  ;;  %v4753_v23 = vpop.trf.xlu1 }
 0x27a   :  { %4021 = vmatmul.mubr.msk.f32.gmra.mrb[70].mxu0 %vm760_vm0, %v4655_v49 }
 0x27b   :  { %4023 = vmatprep.mubr.msk.f32.mxu0 %vm760_vm0, %v4658_v51 }
 0x27d   :  { %v404_v24 = vpop.trf.xlu0  ;;  %v4759_v25 = vpop.trf.xlu1 }
 0x27e   :  { %4024 = vmatmul.mubr.msk.f32.gmra.mrb[72].mxu0 %vm760_vm0, %v4661_v53 }
 0x27f   :  { %4026 = vmatprep.mubr.msk.f32.mxu0 %vm760_vm0, %v4664_v55 }
 0x281   :  { %v405_v27 = vpop.trf.xlu0  ;;  %v4765_v28 = vpop.trf.xlu1 }
 0x282   :  { %4027 = vmatmul.mubr.msk.f32.gmra.mrb[74].mxu0 %vm760_vm0, %v4667_v58 }
 0x283   :  { %4029 = vmatprep.mubr.msk.f32.mxu0 %vm760_vm0, %v4670_v62 }
 0x285   :  { %v406_v30 = vpop.trf.xlu0  ;;  %v4771_v31 = vpop.trf.xlu1  ;;  %568 = vxpose.xlu0.b32.start.end [1/1] (short) %v4619_v26, 128 }
 0x286   :  { %4030 = vmatmul.mubr.msk.f32.gmra.mrb[76].mxu0 %vm760_vm0, %v4673_v2 }
 0x287   :  { %4032 = vmatprep.mubr.msk.f32.mxu0 %vm760_vm0, %v4677_v6 }
 0x289   :  { %v407_v32 = vpop.trf.xlu0  ;;  %v4778_v33 = vpop.trf.xlu1  ;;  %600 = vxpose.xlu1.b32.start.end [1/1] (short) %v4624_v29, 128 }
 0x28a   :  { %4033 = vmatmul.mubr.msk.f32.gmra.mrb[78].mxu0 %vm760_vm0, %v4683_v8 }
 0x28b   :  { %4035 = vmatprep.mubr.msk.f32.mxu0 %vm760_vm0, %v4685_v10 }
 0x28d   :  { %v4785_v34 = vpop.trf.xlu1  ;;  %v4787_v26 = vpop.trf.xlu0 }
 0x28e   :  { %4036 = vmatmul.mubr.msk.f32.gmra.mrb[80].mxu0 %vm760_vm0, %v4691_v57 }
 0x28f   :  { %4038 = vmatprep.mubr.msk.f32.mxu0 %vm760_vm0, %v394_v59 }
 0x291   :  { %v4792_v35 = vpop.trf.xlu0  ;;  %v4794_v36 = vpop.trf.xlu1 }
 0x292   :  { %4039 = vmatmul.mubr.msk.f32.gmra.mrb[82].mxu0 %vm760_vm0, %v395_v63 }
 0x293   :  { %4041 = vmatprep.mubr.msk.f32.mxu0 %vm760_vm0, %v396_v3 }
 0x295   :  { %v4798_v29 = vpop.trf.xlu0  ;;  %v4800_v37 = vpop.trf.xlu1 }
 0x296   :  { %4042 = vmatmul.mubr.msk.f32.gmra.mrb[84].mxu0 %vm760_vm0, %v397_v7 }
 0x297   :  { %4044 = vmatprep.mubr.msk.f32.mxu0 %vm760_vm0, %v398_v11 }
 0x299   :  { %v4804_v38 = vpop.trf.xlu0  ;;  %v4806_v39 = vpop.trf.xlu1 }
 0x29a   :  { %4045 = vmatmul.mubr.msk.f32.gmra.mrb[86].mxu0 %vm760_vm0, %v399_v14 }
 0x29b   :  { %4047 = vmatprep.mubr.msk.f32.mxu0 %vm760_vm0, %v400_v16 }
 0x29d   :  { %v4810_v43 = vpop.trf.xlu0  ;;  %v4812_v44 = vpop.trf.xlu1 }
 0x29e   :  { %4048 = vmatmul.mubr.msk.f32.gmra.mrb[88].mxu0 %vm760_vm0, %v401_v18 }
 0x29f   :  { %4050 = vmatprep.mubr.msk.f32.mxu0 %vm760_vm0, %v402_v20 }
 0x2a1   :  { %v4816_v46 = vpop.trf.xlu0  ;;  %v4818_v47 = vpop.trf.xlu1 }
 0x2a2   :  { %4051 = vmatmul.mubr.msk.f32.gmra.mrb[90].mxu0 %vm760_vm0, %v403_v22 }
 0x2a3   :  { %4053 = vmatprep.mubr.msk.f32.mxu0 %vm760_vm0, %v404_v24 }
 0x2a5   :  { %v4822_v48 = vpop.trf.xlu0  ;;  %v4824_v49 = vpop.trf.xlu1 }
 0x2a6   :  { %v4826_v50 = vpop.f32.mrb[16].mxu0  ;;  %4054 = vmatmul.mubr.msk.f32.gmra.mrb[92].mxu0 %vm760_vm0, %v405_v27 }
 0x2a7   :  { %v4829_v51 = vpop.f32.mrb[17].mxu0  ;;  %4056 = vmatprep.mubr.msk.f32.mxu0 %vm760_vm0, %v406_v30 }
 0x2a9   :  { %v4832_v52 = vpop.trf.xlu0  ;;  %v4834_v53 = vpop.trf.xlu1 }
 0x2aa   :  { %4057 = vmatmul.mubr.msk.f32.gmra.mrb[94].mxu0 %vm760_vm0, %v407_v32 }
 0x2ab   :  { %4059 = vmatprep.mubr.msk.f32.mxu0 %vm760_vm0, %v4693_v12 }
 0x2ad   :  { %v464_v54 = vpop.trf.xlu0  ;;  %v4839_v55 = vpop.trf.xlu1 }
 0x2ae   :  { %v4841_v56 = vpop.f32.mrb[18].mxu0  ;;  %4060 = vmatmul.mubr.msk.f32.gmra.mrb[96].mxu0 %vm760_vm0, %v4699_v61  ;;  %4095 = vmatprep.mubr.msk.f32.mxu1 %vm760_vm0, %v464_v54 }
 0x2af   :  { %v4846_v58 = vpop.f32.mrb[19].mxu0  ;;  %4062 = vmatprep.mubr.msk.f32.mxu0 %vm760_vm0, %v4705_v1 }
 0x2b1   :  { %v465_v60 = vpop.trf.xlu0  ;;  %v4850_v62 = vpop.trf.xlu1 }
 0x2b2   :  { %4063 = vmatmul.mubr.msk.f32.gmra.mrb[98].mxu0 %vm760_vm0, %v4711_v5  ;;  %4096 = vmatmul.mubr.msk.f32.vlgmr.msra.gmra.mrb[0].mxu1 %vm760_vm0, %v465_v60 }
 0x2b3   :  { %4065 = vmatprep.mubr.msk.f32.mxu0 %vm760_vm0, %v4717_v9 }
 0x2b5   :  { %v466_v0 = vpop.trf.xlu0  ;;  %v4857_v2 = vpop.trf.xlu1 }
 0x2b6   :  { %v4859_v4 = vpop.f32.mrb[20].mxu0  ;;  %4066 = vmatmul.mubr.msk.f32.gmra.mrb[100].mxu0 %vm760_vm0, %v4723_v13  ;;  %4098 = vmatprep.mubr.msk.f32.mxu1 %vm760_vm0, %v466_v0 }
 0x2b7   :  { %v4864_v6 = vpop.f32.mrb[21].mxu0  ;;  %4068 = vmatprep.mubr.msk.f32.mxu0 %vm760_vm0, %v4729_v15 }
 0x2b9   :  { %v467_v8 = vpop.trf.xlu0  ;;  %v4868_v10 = vpop.trf.xlu1 }
 0x2ba   :  { %4069 = vmatmul.mubr.msk.f32.gmra.mrb[102].mxu0 %vm760_vm0, %v4735_v17  ;;  %4099 = vmatmul.mubr.msk.f32.gmra.mrb[2].mxu1 %vm760_vm0, %v467_v8 }
 0x2bb   :  { %4071 = vmatprep.mubr.msk.f32.mxu0 %vm760_vm0, %v4741_v19 }
 0x2bd   :  { %v468_v57 = vpop.trf.xlu0  ;;  %v499_v12 = vpop.trf.xlu1 }
 0x2be   :  { %v4875_v59 = vpop.f32.mrb[22].mxu0  ;;  %4072 = vmatmul.mubr.msk.f32.gmra.mrb[104].mxu0 %vm760_vm0, %v4747_v21  ;;  %4101 = vmatprep.mubr.msk.f32.mxu1 %vm760_vm0, %v468_v57 }
 0x2bf   :  { %v4880_v61 = vpop.f32.mrb[23].mxu0  ;;  %4074 = vmatprep.mubr.msk.f32.mxu0 %vm760_vm0, %v4753_v23 }
 0x2c1   :  { %v469_v63 = vpop.trf.xlu0  ;;  %v500_v1 = vpop.trf.xlu1 }
 0x2c2   :  { %4075 = vmatmul.mubr.msk.f32.gmra.mrb[106].mxu0 %vm760_vm0, %v4759_v25  ;;  %4102 = vmatmul.mubr.msk.f32.gmra.mrb[4].mxu1 %vm760_vm0, %v469_v63 }
 0x2c3   :  { %4077 = vmatprep.mubr.msk.f32.mxu0 %vm760_vm0, %v4765_v28 }
 0x2c5   :  { %v470_v3 = vpop.trf.xlu0  ;;  %v501_v5 = vpop.trf.xlu1  ;;  %632 = vxpose.xlu0.b32.start.end [1/1] (short) %v4641_v40, 128 }
 0x2c6   :  { %v4890_v7 = vpop.f32.mrb[24].mxu0  ;;  %4078 = vmatmul.mubr.msk.f32.gmra.mrb[108].mxu0 %vm760_vm0, %v4771_v31  ;;  %4104 = vmatprep.mubr.msk.f32.mxu1 %vm760_vm0, %v470_v3 }
 0x2c7   :  { %v4895_v9 = vpop.f32.mrb[25].mxu0  ;;  %4080 = vmatprep.mubr.msk.f32.mxu0 %vm760_vm0, %v4778_v33 }
 0x2c9   :  { %v471_v11 = vpop.trf.xlu0  ;;  %v502_v13 = vpop.trf.xlu1  ;;  %664 = vxpose.xlu1.b32.start.end [1/1] (short) %v4643_v41, 128 }
 0x2ca   :  { %4081 = vmatmul.mubr.msk.f32.gmra.mrb[110].mxu0 %vm760_vm0, %v4785_v34  ;;  %4105 = vmatmul.mubr.msk.f32.gmra.mrb[6].mxu1 %vm760_vm0, %v471_v11 }
 0x2cb   :  { %4083 = vmatprep.mubr.msk.f32.mxu0 %vm760_vm0, %v4787_v26  ;;  %4107 = vmatprep.mubr.msk.f32.mxu1 %vm760_vm0, %v4794_v36 }
 0x2cd   :  { %v503_v40 = vpop.trf.xlu1  ;;  %v520_v14 = vpop.trf.xlu0 }
 0x2ce   :  { %v4907_v15 = vpop.f32.mrb[26].mxu0  ;;  %4084 = vmatmul.mubr.msk.f32.gmra.mrb[112].mxu0 %vm760_vm0, %v4792_v35  ;;  %4108 = vmatmul.mubr.msk.f32.gmra.mrb[8].mxu1 %vm760_vm0, %v4800_v37 }
 0x2cf   :  { %v4913_v41 = vpop.f32.mrb[27].mxu0  ;;  %4086 = vmatprep.mubr.msk.f32.mxu0 %vm760_vm0, %v4798_v29  ;;  %4110 = vmatprep.mubr.msk.f32.mxu1 %vm760_vm0, %v4806_v39 }
 0x2d1   :  { %v521_v16 = vpop.trf.xlu0  ;;  %v4919_v17 = vpop.trf.xlu1 }
 0x2d2   :  { %4087 = vmatmul.mubr.msk.f32.gmra.mrb[114].mxu0 %vm760_vm0, %v4804_v38  ;;  %4111 = vmatmul.mubr.msk.f32.gmra.mrb[10].mxu1 %vm760_vm0, %v4812_v44 }
 0x2d3   :  { %4089 = vmatprep.mubr.msk.f32.mxu0 %vm760_vm0, %v4810_v43  ;;  %4113 = vmatprep.mubr.msk.f32.mxu1 %vm760_vm0, %v4818_v47 }
 0x2d5   :  { %v522_v18 = vpop.trf.xlu0  ;;  %v4929_v19 = vpop.trf.xlu1 }
 0x2d6   :  { %v4931_v20 = vpop.f32.mrb[28].mxu0  ;;  %4090 = vmatmul.mubr.msk.f32.gmra.mrb[116].mxu0 %vm760_vm0, %v4816_v46  ;;  %4114 = vmatmul.mubr.msk.f32.gmra.mrb[12].mxu1 %vm760_vm0, %v4824_v49 }
 0x2d7   :  { %v4937_v21 = vpop.f32.mrb[29].mxu0  ;;  %4092 = vmatprep.mubr.msk.f32.mxu0 %vm760_vm0, %v4822_v48  ;;  %4116 = vmatprep.mubr.msk.f32.mxu1 %vm760_vm0, %v4834_v53 }
 0x2d9   :  { %v523_v22 = vpop.trf.xlu0  ;;  %v4943_v23 = vpop.trf.xlu1 }
 0x2da   :  { %4093 = vmatmul.mubr.msk.f32.gmra.mrb[118].mxu0 %vm760_vm0, %v4832_v52  ;;  %4117 = vmatmul.mubr.msk.f32.gmra.mrb[14].mxu1 %vm760_vm0, %v4839_v55 }
 0x2db   :  { %4119 = vmatprep.mubr.msk.f32.mxu1 %vm760_vm0, %v4850_v62 }
 0x2dd   :  { %v524_v24 = vpop.trf.xlu0  ;;  %v4951_v25 = vpop.trf.xlu1 }
 0x2de   :  { %v4953_v27 = vpop.f32.mrb[30].mxu0  ;;  %4120 = vmatmul.mubr.msk.f32.gmra.mrb[16].mxu1 %vm760_vm0, %v4857_v2 }
 0x2df   :  { %v4957_v28 = vpop.f32.mrb[31].mxu0  ;;  %4122 = vmatprep.mubr.msk.f32.mxu1 %vm760_vm0, %v4868_v10 }
 0x2e1   :  { %v525_v30 = vpop.trf.xlu0  ;;  %v4961_v31 = vpop.trf.xlu1 }
 0x2e2   :  { %4123 = vmatmul.mubr.msk.f32.gmra.mrb[18].mxu1 %vm760_vm0, %v499_v12 }
 0x2e3   :  { %4125 = vmatprep.mubr.msk.f32.mxu1 %vm760_vm0, %v500_v1 }
 0x2e5   :  { %v526_v32 = vpop.trf.xlu0  ;;  %v4965_v33 = vpop.trf.xlu1 }
 0x2e6   :  { %v4967_v34 = vpop.f32.mrb[32].mxu0  ;;  %4126 = vmatmul.mubr.msk.f32.gmra.mrb[20].mxu1 %vm760_vm0, %v501_v5 }
 0x2e7   :  { %v4970_v26 = vpop.f32.mrb[33].mxu0  ;;  %4128 = vmatprep.mubr.msk.f32.mxu1 %vm760_vm0, %v502_v13 }
 0x2e9   :  { %v527_v35 = vpop.trf.xlu0  ;;  %v558_v36 = vpop.trf.xlu1 }
 0x2ea   :  { %4129 = vmatmul.mubr.msk.f32.gmra.mrb[22].mxu1 %vm760_vm0, %v503_v40 }
 0x2eb   :  { %4131 = vmatprep.mubr.msk.f32.mxu1 %vm760_vm0, %v520_v14 }
 0x2ed   :  { %v528_v29 = vpop.trf.xlu0  ;;  %v559_v37 = vpop.trf.xlu1 }
 0x2ee   :  { %v4975_v38 = vpop.f32.mrb[34].mxu0  ;;  %4132 = vmatmul.mubr.msk.f32.gmra.mrb[24].mxu1 %vm760_vm0, %v521_v16 }
 0x2ef   :  { %v4978_v39 = vpop.f32.mrb[35].mxu0  ;;  %4134 = vmatprep.mubr.msk.f32.mxu1 %vm760_vm0, %v522_v18 }
 0x2f1   :  { %v529_v43 = vpop.trf.xlu0  ;;  %v560_v44 = vpop.trf.xlu1 }
 0x2f2   :  { %4135 = vmatmul.mubr.msk.f32.gmra.mrb[26].mxu1 %vm760_vm0, %v523_v22 }
 0x2f3   :  { %4137 = vmatprep.mubr.msk.f32.mxu1 %vm760_vm0, %v524_v24 }
 0x2f5   :  { %v530_v46 = vpop.trf.xlu0  ;;  %v561_v47 = vpop.trf.xlu1 }
 0x2f6   :  { %v4983_v48 = vpop.f32.mrb[36].mxu0  ;;  %4138 = vmatmul.mubr.msk.f32.gmra.mrb[28].mxu1 %vm760_vm0, %v525_v30 }
 0x2f7   :  { %v4986_v49 = vpop.f32.mrb[37].mxu0  ;;  %4140 = vmatprep.mubr.msk.f32.mxu1 %vm760_vm0, %v526_v32 }
 0x2f9   :  { %v531_v52 = vpop.trf.xlu0  ;;  %v562_v53 = vpop.trf.xlu1 }
 0x2fa   :  { %4141 = vmatmul.mubr.msk.f32.gmra.mrb[30].mxu1 %vm760_vm0, %v527_v35 }
 0x2fb   :  { %4143 = vmatprep.mubr.msk.f32.mxu1 %vm760_vm0, %v528_v29 }
 0x2fd   :  { %v532_v54 = vpop.trf.xlu0  ;;  %v563_v55 = vpop.trf.xlu1 }
 0x2fe   :  { %v4991_v60 = vpop.f32.mrb[38].mxu0  ;;  %4144 = vmatmul.mubr.msk.f32.gmra.mrb[32].mxu1 %vm760_vm0, %v529_v43 }
 0x2ff   :  { %v4994_v62 = vpop.f32.mrb[39].mxu0  ;;  %4146 = vmatprep.mubr.msk.f32.mxu1 %vm760_vm0, %v530_v46 }
 0x301   :  { %v533_v0 = vpop.trf.xlu0  ;;  %v564_v2 = vpop.trf.xlu1 }
 0x302   :  { %4147 = vmatmul.mubr.msk.f32.gmra.mrb[34].mxu1 %vm760_vm0, %v531_v52 }
 0x303   :  { %4149 = vmatprep.mubr.msk.f32.mxu1 %vm760_vm0, %v532_v54 }
 0x305   :  { %v534_v8 = vpop.trf.xlu0  ;;  %v565_v10 = vpop.trf.xlu1  ;;  %696 = vxpose.xlu0.b32.start.end [1/1] (short) %v4645_v42, 128 }
 0x306   :  { %v5000_v57 = vpop.f32.mrb[40].mxu0  ;;  %4150 = vmatmul.mubr.msk.f32.gmra.mrb[36].mxu1 %vm760_vm0, %v533_v0 }
 0x307   :  { %v5003_v12 = vpop.f32.mrb[41].mxu0  ;;  %4152 = vmatprep.mubr.msk.f32.mxu1 %vm760_vm0, %v534_v8 }
 0x309   :  { %v535_v63 = vpop.trf.xlu0  ;;  %v566_v1 = vpop.trf.xlu1  ;;  %728 = vxpose.xlu1.b32.start.end [1/1] (short) %v4650_v45, 128 }
 0x30a   :  { %4153 = vmatmul.mubr.msk.f32.gmra.mrb[38].mxu1 %vm760_vm0, %v535_v63 }
 0x30b   :  { %4155 = vmatprep.mubr.msk.f32.mxu1 %vm760_vm0, %v4919_v17 }
 0x30d   :  { %v5010_v3 = vpop.f32.mrb[42].mxu0  ;;  %v567_v42 = vpop.trf.xlu1 }
 0x30e   :  { %v5012_v5 = vpop.f32.mrb[43].mxu0  ;;  %4156 = vmatmul.mubr.msk.f32.gmra.mrb[40].mxu1 %vm760_vm0, %v4929_v19  ;;  %v584_v11 = vpop.trf.xlu0 }
 0x30f   :  { %4158 = vmatprep.mubr.msk.f32.mxu1 %vm760_vm0, %v4943_v23 }
 0x311   :  { %v5018_v13 = vpop.trf.xlu1 }
 0x312   :  { %4159 = vmatmul.mubr.msk.f32.gmra.mrb[42].mxu1 %vm760_vm0, %v4951_v25  ;;  %v585_v45 = vpop.trf.xlu0 }
 0x313   :  { %4161 = vmatprep.mubr.msk.f32.mxu1 %vm760_vm0, %v4961_v31 }
 0x315   :  { %v5024_v40 = vpop.f32.mrb[44].mxu0  ;;  %v5026_v14 = vpop.trf.xlu1 }
 0x316   :  { %v5028_v16 = vpop.f32.mrb[45].mxu0  ;;  %4162 = vmatmul.mubr.msk.f32.gmra.mrb[44].mxu1 %vm760_vm0, %v4965_v33  ;;  %v586_v17 = vpop.trf.xlu0 }
 0x317   :  { %4164 = vmatprep.mubr.msk.f32.mxu1 %vm760_vm0, %v558_v36 }
 0x319   :  { %v5033_v18 = vpop.trf.xlu1 }
 0x31a   :  { %4165 = vmatmul.mubr.msk.f32.gmra.mrb[46].mxu1 %vm760_vm0, %v559_v37  ;;  %v587_v19 = vpop.trf.xlu0 }
 0x31b   :  { %4167 = vmatprep.mubr.msk.f32.mxu1 %vm760_vm0, %v560_v44 }
 0x31d   :  { %v5037_v22 = vpop.f32.mrb[46].mxu0  ;;  %v5039_v23 = vpop.trf.xlu1 }
 0x31e   :  { %v5041_v24 = vpop.f32.mrb[47].mxu0  ;;  %4168 = vmatmul.mubr.msk.f32.gmra.mrb[48].mxu1 %vm760_vm0, %v561_v47  ;;  %v588_v25 = vpop.trf.xlu0 }
 0x31f   :  { %4170 = vmatprep.mubr.msk.f32.mxu1 %vm760_vm0, %v562_v53 }
 0x321   :  { %v5045_v30 = vpop.f32.mrb[48].mxu0  ;;  %v5047_v31 = vpop.trf.xlu1 }
 0x322   :  { %v5049_v32 = vpop.f32.mrb[49].mxu0  ;;  %4171 = vmatmul.mubr.msk.f32.gmra.mrb[50].mxu1 %vm760_vm0, %v563_v55  ;;  %v589_v33 = vpop.trf.xlu0 }
 0x323   :  { %4173 = vmatprep.mubr.msk.f32.mxu1 %vm760_vm0, %v564_v2 }
 0x325   :  { %v5053_v35 = vpop.f32.mrb[50].mxu0  ;;  %v5055_v36 = vpop.trf.xlu1 }
 0x326   :  { %v5057_v29 = vpop.f32.mrb[51].mxu0  ;;  %4174 = vmatmul.mubr.msk.f32.gmra.mrb[52].mxu1 %vm760_vm0, %v565_v10  ;;  %v590_v37 = vpop.trf.xlu0 }
 0x327   :  { %4176 = vmatprep.mubr.msk.f32.mxu1 %vm760_vm0, %v566_v1 }
 0x329   :  { %v5061_v43 = vpop.f32.mrb[52].mxu0  ;;  %v5063_v44 = vpop.trf.xlu1 }
 0x32a   :  { %v5065_v46 = vpop.f32.mrb[53].mxu0  ;;  %4177 = vmatmul.mubr.msk.f32.gmra.mrb[54].mxu1 %vm760_vm0, %v567_v42  ;;  %v591_v47 = vpop.trf.xlu0 }
 0x32b   :  { %4179 = vmatprep.mubr.msk.f32.mxu1 %vm760_vm0, %v584_v11 }
 0x32d   :  { %v5069_v52 = vpop.f32.mrb[54].mxu0  ;;  %v5071_v53 = vpop.trf.xlu1 }
 0x32e   :  { %v5073_v54 = vpop.f32.mrb[55].mxu0  ;;  %v592_v55 = vpop.trf.xlu0  ;;  %4180 = vmatmul.mubr.msk.f32.gmra.mrb[56].mxu1 %vm760_vm0, %v585_v45 }
 0x32f   :  { %4182 = vmatprep.mubr.msk.f32.mxu1 %vm760_vm0, %v586_v17 }
 0x331   :  { %v5077_v0 = vpop.f32.mrb[56].mxu0  ;;  %v5079_v2 = vpop.trf.xlu1 }
 0x332   :  { %5843 = vst [vmem:[#allocation12_spill] sm:$0xff] %v5077_v0  ;;  %v5081_v8 = vpop.f32.mrb[57].mxu0  ;;  %v593_v10 = vpop.trf.xlu0  ;;  %4183 = vmatmul.mubr.msk.f32.gmra.mrb[58].mxu1 %vm760_vm0, %v587_v19 }
 0x333   :  { %4185 = vmatprep.mubr.msk.f32.mxu1 %vm760_vm0, %v588_v25 }
 0x335   :  { %v5085_v63 = vpop.f32.mrb[58].mxu0  ;;  %v5087_v1 = vpop.trf.xlu1 }
 0x336   :  { %5844 = vst [vmem:[#allocation13_spill] sm:$0xff] %v5085_v63  ;;  %v5089_v42 = vpop.f32.mrb[59].mxu0  ;;  %v594_v11 = vpop.trf.xlu0  ;;  %4186 = vmatmul.mubr.msk.f32.gmra.mrb[60].mxu1 %vm760_vm0, %v589_v33 }
 0x337   :  { %5845 = vst [vmem:[#allocation14_spill] sm:$0xff] %v5089_v42  ;;  %4188 = vmatprep.mubr.msk.f32.mxu1 %vm760_vm0, %v590_v37 }
 0x339   :  { %v5093_v45 = vpop.f32.mrb[60].mxu0  ;;  %v5095_v17 = vpop.trf.xlu1 }
 0x33a   :  { %5846 = vst [vmem:[#allocation15_spill] sm:$0xff] %v5093_v45  ;;  %v5097_v0 = vpop.f32.mrb[61].mxu0  ;;  %v595_v19 = vpop.trf.xlu0  ;;  %4189 = vmatmul.mubr.msk.f32.gmra.mrb[62].mxu1 %vm760_vm0, %v591_v47 }
 0x33b   :  { %4191 = vmatprep.mubr.msk.f32.mxu1 %vm760_vm0, %v592_v55 }
 0x33d   :  { %v5101_v25 = vpop.f32.mrb[62].mxu0  ;;  %v5103_v63 = vpop.trf.xlu1 }
 0x33e   :  { %5847 = vst [vmem:[#allocation16_spill] sm:$0xff] %v5101_v25  ;;  %v5105_v42 = vpop.f32.mrb[63].mxu0  ;;  %v596_v33 = vpop.trf.xlu0  ;;  %4192 = vmatmul.mubr.msk.f32.gmra.mrb[64].mxu1 %vm760_vm0, %v593_v10 }
 0x33f   :  { %5848 = vst [vmem:[#allocation17_spill] sm:$0xff] %v5105_v42  ;;  %4194 = vmatprep.mubr.msk.f32.mxu1 %vm760_vm0, %v594_v11 }
 0x341   :  { %v5109_v37 = vpop.f32.mrb[64].mxu0  ;;  %v5111_v45 = vpop.trf.xlu1 }
 0x342   :  { %2877 = vxpose.xlu0.b32.start [1/16] (narrow) %v4829_v51, 8  ;;  %v5114_v47 = vpop.f32.mrb[65].mxu0  ;;  %v597_v55 = vpop.trf.xlu0  ;;  %4195 = vmatmul.mubr.msk.f32.gmra.mrb[66].mxu1 %vm760_vm0, %v595_v19 }
 0x343   :  { %4197 = vmatprep.mubr.msk.f32.mxu1 %vm760_vm0, %v596_v33 }
 0x345   :  { %v5118_v25 = vpop.f32.mrb[66].mxu0  ;;  %v5120_v42 = vpop.trf.xlu1 }
 0x346   :  { %5849 = vst [vmem:[#allocation18_spill] sm:$0xff] %v5118_v25  ;;  %2878 = vxpose.xlu0.b32.cont [2/16] (narrow) %v4826_v50, 8  ;;  %2909 = vxpose.xlu1.b32.start [1/16] (narrow) %v4970_v26, 8  ;;  %v5124_v10 = vpop.f32.mrb[67].mxu0  ;;  %v598_v11 = vpop.trf.xlu0 }
 0x347   :  { %4198 = vmatmul.mubr.msk.f32.gmra.mrb[68].mxu1 %vm760_vm0, %v597_v55 }
 0x348   :  { %4200 = vmatprep.mubr.msk.f32.mxu1 %vm760_vm0, %v598_v11 }
 0x349   :  { %v5128_v51 = vpop.f32.mrb[68].mxu0  ;;  %v630_v19 = vpop.trf.xlu1 }
 0x34a   :  { %2879 = vxpose.xlu0.b32.cont [3/16] (narrow) %v4846_v58, 8  ;;  %2910 = vxpose.xlu1.b32.cont [2/16] (narrow) %v4967_v34, 8  ;;  %v5132_v33 = vpop.f32.mrb[69].mxu0  ;;  %v599_v25 = vpop.trf.xlu0 }
 0x34b   :  { %4201 = vmatmul.mubr.msk.f32.gmra.mrb[70].mxu1 %vm760_vm0, %v599_v25 }
 0x34c   :  { %4203 = vmatprep.mubr.msk.f32.mxu1 %vm760_vm0, %v5018_v13 }
 0x34d   :  { %v5137_v50 = vpop.f32.mrb[70].mxu0  ;;  %v631_v26 = vpop.trf.xlu1 }
 0x34e   :  { %2880 = vxpose.xlu0.b32.cont [4/16] (narrow) %v4841_v56, 8  ;;  %2911 = vxpose.xlu1.b32.cont [3/16] (narrow) %v4978_v39, 8  ;;  %v5141_v55 = vpop.f32.mrb[71].mxu0  ;;  %v648_v58 = vpop.trf.xlu0 }
 0x34f   :  { %4204 = vmatmul.mubr.msk.f32.gmra.mrb[72].mxu1 %vm760_vm0, %v5026_v14 }
 0x350   :  { %4206 = vmatprep.mubr.msk.f32.mxu1 %vm760_vm0, %v5033_v18 }
 0x351   :  { %v5147_v34 = vpop.f32.mrb[72].mxu0  ;;  %v5149_v25 = vpop.trf.xlu1 }
 0x352   :  { %2881 = vxpose.xlu0.b32.cont [5/16] (narrow) %v4864_v6, 8  ;;  %2912 = vxpose.xlu1.b32.cont [4/16] (narrow) %v4975_v38, 8  ;;  %v5153_v56 = vpop.f32.mrb[73].mxu0  ;;  %v649_v39 = vpop.trf.xlu0 }
 0x353   :  { %4207 = vmatmul.mubr.msk.f32.gmra.mrb[74].mxu1 %vm760_vm0, %v5039_v23 }
 0x354   :  { %4209 = vmatprep.mubr.msk.f32.mxu1 %vm760_vm0, %v5047_v31 }
 0x355   :  { %v5159_v13 = vpop.f32.mrb[74].mxu0  ;;  %v5161_v14 = vpop.trf.xlu1 }
 0x356   :  { %2882 = vxpose.xlu0.b32.cont [6/16] (narrow) %v4859_v4, 8  ;;  %2913 = vxpose.xlu1.b32.cont [5/16] (narrow) %v4986_v49, 8  ;;  %v5165_v6 = vpop.f32.mrb[75].mxu0  ;;  %v650_v38 = vpop.trf.xlu0 }
 0x357   :  { %4210 = vmatmul.mubr.msk.f32.gmra.mrb[76].mxu1 %vm760_vm0, %v5055_v36 }
 0x358   :  { %4212 = vmatprep.mubr.msk.f32.mxu1 %vm760_vm0, %v5063_v44 }
 0x359   :  { %v5171_v18 = vpop.f32.mrb[76].mxu0  ;;  %v5173_v23 = vpop.trf.xlu1 }
 0x35a   :  { %2883 = vxpose.xlu0.b32.cont [7/16] (narrow) %v4880_v61, 8  ;;  %2914 = vxpose.xlu1.b32.cont [6/16] (narrow) %v4983_v48, 8  ;;  %v5177_v4 = vpop.f32.mrb[77].mxu0  ;;  %v651_v49 = vpop.trf.xlu0 }
 0x35b   :  { %4213 = vmatmul.mubr.msk.f32.gmra.mrb[78].mxu1 %vm760_vm0, %v5071_v53 }
 0x35c   :  { %4215 = vmatprep.mubr.msk.f32.mxu1 %vm760_vm0, %v5079_v2 }
 0x35d   :  { %v5183_v31 = vpop.f32.mrb[78].mxu0  ;;  %v5185_v36 = vpop.trf.xlu1 }
 0x35e   :  { %2884 = vxpose.xlu0.b32.cont [8/16] (narrow) %v4875_v59, 8  ;;  %2915 = vxpose.xlu1.b32.cont [7/16] (narrow) %v4994_v62, 8  ;;  %v5189_v61 = vpop.f32.mrb[79].mxu0  ;;  %v652_v48 = vpop.trf.xlu0 }
 0x35f   :  { %4216 = vmatmul.mubr.msk.f32.gmra.mrb[80].mxu1 %vm760_vm0, %v5087_v1 }
 0x360   :  { %4218 = vmatprep.mubr.msk.f32.mxu1 %vm760_vm0, %v5095_v17 }
 0x361   :  { %v5195_v44 = vpop.f32.mrb[80].mxu0  ;;  %v5197_v53 = vpop.trf.xlu1 }
 0x362   :  { %2885 = vxpose.xlu0.b32.cont [9/16] (narrow) %v4895_v9, 8  ;;  %2916 = vxpose.xlu1.b32.cont [8/16] (narrow) %v4991_v60, 8  ;;  %v5201_v59 = vpop.f32.mrb[81].mxu0  ;;  %v653_v62 = vpop.trf.xlu0 }
 0x363   :  { %4219 = vmatmul.mubr.msk.f32.gmra.mrb[82].mxu1 %vm760_vm0, %v5103_v63 }
 0x364   :  { %4221 = vmatprep.mubr.msk.f32.mxu1 %vm760_vm0, %v5111_v45 }
 0x365   :  { %v5207_v2 = vpop.f32.mrb[82].mxu0  ;;  %v5209_v1 = vpop.trf.xlu1 }
 0x366   :  { %2886 = vxpose.xlu0.b32.cont [10/16] (narrow) %v4890_v7, 8  ;;  %2917 = vxpose.xlu1.b32.cont [9/16] (narrow) %v5003_v12, 8  ;;  %v5213_v9 = vpop.f32.mrb[83].mxu0  ;;  %v654_v60 = vpop.trf.xlu0 }
 0x367   :  { %4222 = vmatmul.mubr.msk.f32.gmra.mrb[84].mxu1 %vm760_vm0, %v5120_v42 }
 0x368   :  { %4224 = vmatprep.mubr.msk.f32.mxu1 %vm760_vm0, %v630_v19 }
 0x369   :  { %v5218_v63 = vpop.f32.mrb[84].mxu0  ;;  %v5225_v7 = vpop.trf.xlu1 }
 0x36a   :  { %2887 = vxpose.xlu0.b32.cont [11/16] (narrow) %v4913_v41, 8  ;;  %2918 = vxpose.xlu1.b32.cont [10/16] (narrow) %v5000_v57, 8  ;;  %v5222_v45 = vpop.f32.mrb[85].mxu0  ;;  %v655_v17 = vpop.trf.xlu0 }
 0x36b   :  { %4225 = vmatmul.mubr.msk.f32.gmra.mrb[86].mxu1 %vm760_vm0, %v631_v26 }
 0x36c   :  { %4227 = vmatprep.mubr.msk.f32.mxu1 %vm760_vm0, %v648_v58 }
 0x36d   :  { %v5228_v12 = vpop.f32.mrb[86].mxu0  ;;  %v5238_v11 = vpop.trf.xlu1 }
 0x36e   :  { %2888 = vxpose.xlu0.b32.cont [12/16] (narrow) %v4907_v15, 8  ;;  %2919 = vxpose.xlu1.b32.cont [11/16] (narrow) %v5012_v5, 8  ;;  %v5232_v42 = vpop.f32.mrb[87].mxu0  ;;  %v656_v41 = vpop.trf.xlu0 }
 0x36f   :  { %4228 = vmatmul.mubr.msk.f32.gmra.mrb[88].mxu1 %vm760_vm0, %v649_v39 }
 0x370   :  { %4230 = vmatprep.mubr.msk.f32.mxu1 %vm760_vm0, %v650_v38 }
 0x371   :  { %v5236_v57 = vpop.f32.mrb[88].mxu0 }
 0x372   :  { %2889 = vxpose.xlu0.b32.cont [13/16] (narrow) %v4937_v21, 8  ;;  %2920 = vxpose.xlu1.b32.cont [12/16] (narrow) %v5010_v3, 8  ;;  %v5242_v19 = vpop.f32.mrb[89].mxu0  ;;  %v657_v15 = vpop.trf.xlu0 }
 0x373   :  { %4231 = vmatmul.mubr.msk.f32.gmra.mrb[90].mxu1 %vm760_vm0, %v651_v49  ;;  %v5253_v21 = vpop.trf.xlu1 }
 0x374   :  { %4233 = vmatprep.mubr.msk.f32.mxu1 %vm760_vm0, %v652_v48 }
 0x375   :  { %v5246_v5 = vpop.f32.mrb[90].mxu0 }
 0x376   :  { %2890 = vxpose.xlu0.b32.cont [14/16] (narrow) %v4931_v20, 8  ;;  %2921 = vxpose.xlu1.b32.cont [13/16] (narrow) %v5028_v16, 8  ;;  %v5250_v26 = vpop.f32.mrb[91].mxu0  ;;  %v658_v58 = vpop.trf.xlu0 }
 0x377   :  { %4234 = vmatmul.mubr.msk.f32.gmra.mrb[92].mxu1 %vm760_vm0, %v653_v62  ;;  %v5266_v38 = vpop.trf.xlu1 }
 0x378   :  { %4236 = vmatprep.mubr.msk.f32.mxu1 %vm760_vm0, %v654_v60 }
 0x379   :  { %v5256_v3 = vpop.f32.mrb[92].mxu0 }
 0x37a   :  { %2891 = vxpose.xlu0.b32.cont [15/16] (narrow) %v4957_v28, 8  ;;  %2922 = vxpose.xlu1.b32.cont [14/16] (narrow) %v5024_v40, 8  ;;  %v5260_v39 = vpop.f32.mrb[93].mxu0  ;;  %v659_v20 = vpop.trf.xlu0 }
 0x37b   :  { %4237 = vmatmul.mubr.msk.f32.gmra.mrb[94].mxu1 %vm760_vm0, %v655_v17 }
 0x37c   :  { %4239 = vmatprep.mubr.msk.f32.mxu1 %vm760_vm0, %v656_v41 }
 0x37d   :  { %v5264_v16 = vpop.f32.mrb[94].mxu0 }
 0x37e   :  { %2892 = vxpose.xlu0.b32.end [16/16] (narrow) %v4953_v27, 8  ;;  %2923 = vxpose.xlu1.b32.cont [15/16] (narrow) %v5041_v24, 8  ;;  %v5270_v49 = vpop.f32.mrb[95].mxu0  ;;  %v660_v28 = vpop.trf.xlu0 }
 0x37f   :  { %4240 = vmatmul.mubr.msk.f32.gmra.mrb[96].mxu1 %vm760_vm0, %v657_v15  ;;  %v690_v27 = vpop.trf.xlu1 }
 0x380   :  { %4242 = vmatprep.mubr.msk.f32.mxu1 %vm760_vm0, %v658_v58 }
 0x381   :  { %v5274_v40 = vpop.f32.mrb[96].mxu0 }
 0x382   :  { %2924 = vxpose.xlu1.b32.end [16/16] (narrow) %v5037_v22, 8  ;;  %2941 = vxpose.xlu0.b32.start [1/16] (narrow) %v5049_v32, 8  ;;  %v5278_v48 = vpop.f32.mrb[97].mxu0  ;;  %v661_v62 = vpop.trf.xlu0 }
 0x383   :  { %4243 = vmatmul.mubr.msk.f32.gmra.mrb[98].mxu1 %vm760_vm0, %v659_v20  ;;  %v691_v20 = vpop.trf.xlu1 }
 0x384   :  { %4245 = vmatprep.mubr.msk.f32.mxu1 %vm760_vm0, %v660_v28 }
 0x385   :  { %v5282_v24 = vpop.f32.mrb[98].mxu0  ;;  %v5284_v60 = vpop.f32.mrb[0].mxu1 }
 0x386   :  { %5850 = vst [vmem:[#allocation19_spill] sm:$0xff] %v5282_v24  ;;  %v5286_v17 = vpop.f32.mrb[1].mxu1  ;;  %2942 = vxpose.xlu0.b32.cont [2/16] (narrow) %v5045_v30, 8  ;;  %v5289_v41 = vpop.f32.mrb[99].mxu0 }
 0x387   :  { %5851 = vst [vmem:[#allocation20_spill] sm:$0xff] %v5289_v41  ;;  %v662_v22 = vpop.trf.xlu0  ;;  %4246 = vmatmul.mubr.msk.f32.gmra.mrb[100].mxu1 %vm760_vm0, %v661_v62  ;;  %v5874_v41 = vld [vmem:[#allocation17_spill] sm:$0xff] }
 0x388   :  { %4248 = vmatprep.mubr.msk.f32.mxu1 %vm760_vm0, %v662_v22 }
 0x389   :  { %v5293_v32 = vpop.f32.mrb[100].mxu0 }
 0x38a   :  { %5852 = vst [vmem:[#allocation21_spill] sm:$0xff] %v5293_v32  ;;  %2943 = vxpose.xlu0.b32.cont [3/16] (narrow) %v5057_v29, 8  ;;  %v5296_v15 = vpop.f32.mrb[101].mxu0 }
 0x38b   :  { %5853 = vst [vmem:[#allocation22_spill] sm:$0xff] %v5296_v15  ;;  %v663_v58 = vpop.trf.xlu0 }
 0x38c   :  { %4249 = vmatmul.mubr.msk.f32.gmra.mrb[102].mxu1 %vm760_vm0, %v663_v58 }
 0x38d   :  { %v5299_v28 = vpop.f32.mrb[102].mxu0  ;;  %v5301_v30 = vpop.f32.mrb[2].mxu1  ;;  %4251 = vmatprep.mubr.msk.f32.mxu1 %vm760_vm0, %v5149_v25 }
 0x38e   :  { %5854 = vst [vmem:[#allocation23_spill] sm:$0xff] %v5299_v28  ;;  %5855 = vst [vmem:[#allocation24_spill] sm:$0xff] %v5301_v30  ;;  %v5305_v62 = vpop.f32.mrb[3].mxu1  ;;  %2944 = vxpose.xlu0.b32.cont [4/16] (narrow) %v5053_v35, 8  ;;  %v5308_v22 = vpop.f32.mrb[103].mxu0  ;;  %v5872_v30 = vld [vmem:[#allocation13_spill] sm:$0xff] }
 0x38f   :  { %5856 = vst [vmem:[#allocation25_spill] sm:$0xff] %v5305_v62  ;;  %5857 = vst [vmem:[#allocation26_spill] sm:$0xff] %v5308_v22  ;;  %v5310_v29 = vpop.trf.xlu0  ;;  %v692_v35 = vpop.trf.xlu1  ;;  %v5873_v62 = vld [vmem:[#allocation15_spill] sm:$0xff] }
 0x390   :  { %4252 = vmatmul.mubr.msk.f32.gmra.mrb[104].mxu1 %vm760_vm0, %v5161_v14 }
 0x391   :  { %v5314_v58 = vpop.f32.mrb[104].mxu0  ;;  %4254 = vmatprep.mubr.msk.f32.mxu1 %vm760_vm0, %v5173_v23 }
 0x392   :  { %5858 = vst [vmem:[#allocation27_spill] sm:$0xff] %v5314_v58  ;;  %2945 = vxpose.xlu0.b32.cont [5/16] (narrow) %v5065_v46, 8  ;;  %v5319_v28 = vpop.f32.mrb[105].mxu0 }
 0x393   :  { %5859 = vst [vmem:[#allocation28_spill] sm:$0xff] %v5319_v28  ;;  %v5321_v25 = vpop.trf.xlu0 }
 0x394   :  { %4255 = vmatmul.mubr.msk.f32.gmra.mrb[106].mxu1 %vm760_vm0, %v5185_v36 }
 0x395   :  { %v5325_v22 = vpop.f32.mrb[106].mxu0  ;;  %v5327_v32 = vpop.f32.mrb[4].mxu1  ;;  %4257 = vmatprep.mubr.msk.f32.mxu1 %vm760_vm0, %v5197_v53 }
 0x396   :  { %5860 = vst [vmem:[#allocation29_spill] sm:$0xff] %v5325_v22  ;;  %5861 = vst [vmem:[#allocation30_spill] sm:$0xff] %v5327_v32  ;;  %v5331_v14 = vpop.f32.mrb[5].mxu1  ;;  %2946 = vxpose.xlu0.b32.cont [6/16] (narrow) %v5061_v43, 8  ;;  %v5334_v46 = vpop.f32.mrb[107].mxu0 }
 0x397   :  { %5862 = vst [vmem:[#allocation31_spill] sm:$0xff] %v5331_v14  ;;  %5863 = vst [vmem:[#allocation32_spill] sm:$0xff] %v5334_v46  ;;  %v714_v23 = vpop.trf.xlu0  ;;  %v693_v53 = vpop.trf.xlu1  ;;  %v5871_v14 = vld [vmem:[#allocation14_spill] sm:$0xff] }
 0x398   :  { %4258 = vmatmul.mubr.msk.f32.gmra.mrb[108].mxu1 %vm760_vm0, %v5209_v1 }
 0x399   :  { %v5338_v58 = vpop.f32.mrb[108].mxu0  ;;  %4260 = vmatprep.mubr.msk.f32.mxu1 %vm760_vm0, %v5225_v7 }
 0x39a   :  { %5864 = vst [vmem:[#allocation33_spill] sm:$0xff] %v5338_v58  ;;  %2947 = vxpose.xlu0.b32.cont [7/16] (narrow) %v5073_v54, 8  ;;  %v5343_v36 = vpop.f32.mrb[109].mxu0 }
 0x39b   :  { %5865 = vst [vmem:[#allocation34_spill] sm:$0xff] %v5343_v36  ;;  %v715_v22 = vpop.trf.xlu0  ;;  %v694_v58 = vpop.trf.xlu1 }
 0x39c   :  { %4261 = vmatmul.mubr.msk.f32.gmra.mrb[110].mxu1 %vm760_vm0, %v5238_v11 }
 0x39d   :  { %v5347_v43 = vpop.f32.mrb[110].mxu0  ;;  %v5349_v46 = vpop.f32.mrb[6].mxu1  ;;  %4263 = vmatprep.mubr.msk.f32.mxu1 %vm760_vm0, %v5253_v21 }
 0x39e   :  { %5866 = vst [vmem:[#allocation35_spill] sm:$0xff] %v5347_v43  ;;  %5867 = vst [vmem:[#allocation36_spill] sm:$0xff] %v5349_v46  ;;  %v5353_v1 = vpop.f32.mrb[7].mxu1  ;;  %2948 = vxpose.xlu0.b32.cont [8/16] (narrow) %v5069_v52, 8  ;;  %v5356_v7 = vpop.f32.mrb[111].mxu0  ;;  %v5870_v46 = vld [vmem:[#allocation12_spill] sm:$0xff] }
 0x39f   :  { %5868 = vst [vmem:[#allocation37_spill] sm:$0xff] %v5353_v1  ;;  %5869 = vst [vmem:[#allocation38_spill] sm:$0xff] %v5356_v7  ;;  %v716_v54 = vpop.trf.xlu0 }
 0x3a0   :  { %4264 = vmatmul.mubr.msk.f32.gmra.mrb[112].mxu1 %vm760_vm0, %v5266_v38 }
 0x3a1   :  { %v5360_v36 = vpop.f32.mrb[112].mxu0  ;;  %v4109_v11 = vpop.f32.mrb[8].mxu1  ;;  %4266 = vmatprep.mubr.msk.f32.mxu1 %vm760_vm0, %v690_v27 }
 0x3a2   :  { %v2158_v43 = vpop.f32.mrb[9].mxu1  ;;  %2949 = vxpose.xlu0.b32.cont [9/16] (narrow) %v5081_v8, 8  ;;  %v5364_v21 = vpop.f32.mrb[113].mxu0 }
 0x3a3   :  { %3101 = vxpose.xlu1.b32.start [1/16] (narrow) %v2158_v43, 8  ;;  %v717_v28 = vpop.trf.xlu0  ;;  %v695_v8 = vpop.trf.xlu1 }
 0x3a4   :  { %4267 = vmatmul.mubr.msk.f32.gmra.mrb[114].mxu1 %vm760_vm0, %v691_v20 }
 0x3a5   :  { %v5367_v52 = vpop.f32.mrb[114].mxu0  ;;  %v4112_v7 = vpop.f32.mrb[10].mxu1  ;;  %4269 = vmatprep.mubr.msk.f32.mxu1 %vm760_vm0, %v692_v35 }
 0x3a6   :  { %v2168_v38 = vpop.f32.mrb[11].mxu1  ;;  %2950 = vxpose.xlu0.b32.cont [10/16] (narrow) %v5870_v46, 8  ;;  %v5371_v1 = vpop.f32.mrb[115].mxu0 }
 0x3a7   :  { %3102 = vxpose.xlu1.b32.cont [2/16] (narrow) %v4109_v11, 8  ;;  %v718_v27 = vpop.trf.xlu0 }
 0x3a8   :  { %4270 = vmatmul.mubr.msk.f32.gmra.mrb[116].mxu1 %vm760_vm0, %v693_v53 }
 0x3a9   :  { %v5374_v32 = vpop.f32.mrb[116].mxu0  ;;  %v4115_v43 = vpop.f32.mrb[12].mxu1  ;;  %4272 = vmatprep.mubr.msk.f32.mxu1 %vm760_vm0, %v694_v58 }
 0x3aa   :  { %v2178_v20 = vpop.f32.mrb[13].mxu1  ;;  %2951 = vxpose.xlu0.b32.cont [11/16] (narrow) %v5871_v14, 8  ;;  %v5378_v15 = vpop.f32.mrb[117].mxu0 }
 0x3ab   :  { %3103 = vxpose.xlu1.b32.cont [3/16] (narrow) %v2168_v38, 8  ;;  %v719_v35 = vpop.trf.xlu0 }
 0x3ac   :  { %4273 = vmatmul.mubr.msk.f32.gmra.mrb[118].mxu1 %vm760_vm0, %v695_v8 }
 0x3ad   :  { %v5381_v46 = vpop.f32.mrb[118].mxu0  ;;  %v4118_v11 = vpop.f32.mrb[14].mxu1  ;;  %4275 = vmatprep.mubr.msk.f32.mxu1 %vm760_vm0, %v5310_v29 }
 0x3ae   :  { %v2188_v53 = vpop.f32.mrb[15].mxu1  ;;  %2952 = vxpose.xlu0.b32.cont [12/16] (narrow) %v5872_v30, 8  ;;  %v5386_v24 = vpop.f32.mrb[119].mxu0 }
 0x3af   :  { %3104 = vxpose.xlu1.b32.cont [4/16] (narrow) %v4112_v7, 8  ;;  %v720_v58 = vpop.trf.xlu0 }
 0x3b0   :  { %4276 = vmatmul.mubr.msk.f32.gmra.mrb[120].mxu1 %vm760_vm0, %v5321_v25 }
 0x3b1   :  { %v4121_v14 = vpop.f32.mrb[16].mxu1  ;;  %4278 = vmatprep.mubr.msk.f32.mxu1 %vm760_vm0, %v714_v23 }
 0x3b2   :  { %v2198_v38 = vpop.f32.mrb[17].mxu1  ;;  %2953 = vxpose.xlu0.b32.cont [13/16] (narrow) %v5097_v0, 8 }
 0x3b3   :  { %3105 = vxpose.xlu1.b32.cont [5/16] (narrow) %v2178_v20, 8  ;;  %v721_v8 = vpop.trf.xlu0  ;;  %v5875_v20 = vld [vmem:[#allocation16_spill] sm:$0xff] }
 0x3b4   :  { %4279 = vmatmul.mubr.msk.f32.gmra.mrb[122].mxu1 %vm760_vm0, %v715_v22 }
 0x3b5   :  { %v4124_v29 = vpop.f32.mrb[18].mxu1  ;;  %4281 = vmatprep.mubr.msk.f32.mxu1 %vm760_vm0, %v716_v54 }
 0x3b6   :  { %v2208_v30 = vpop.f32.mrb[19].mxu1  ;;  %2954 = vxpose.xlu0.b32.cont [14/16] (narrow) %v5873_v62, 8 }
 0x3b7   :  { %3106 = vxpose.xlu1.b32.cont [6/16] (narrow) %v4115_v43, 8  ;;  %v722_v7 = vpop.trf.xlu0 }
 0x3b8   :  { %4282 = vmatmul.mubr.msk.f32.gmra.mrb[124].mxu1 %vm760_vm0, %v717_v28 }
 0x3b9   :  { %v4127_v25 = vpop.f32.mrb[20].mxu1  ;;  %4284 = vmatprep.mubr.msk.f32.mxu1 %vm760_vm0, %v718_v27 }
 0x3ba   :  { %v2218_v23 = vpop.f32.mrb[21].mxu1  ;;  %2955 = vxpose.xlu0.b32.cont [15/16] (narrow) %v5874_v41, 8 }
 0x3bb   :  { %3107 = vxpose.xlu1.b32.cont [7/16] (narrow) %v2188_v53, 8  ;;  %v723_v0 = vpop.trf.xlu0 }
 0x3bc   :  { %4285 = vmatmul.mubr.msk.f32.gmra.mrb[126].mxu1 %vm760_vm0, %v719_v35 }
 0x3bd   :  { %v4130_v22 = vpop.f32.mrb[22].mxu1  ;;  %4287 = vmatprep.mubr.msk.f32.mxu1 %vm760_vm0, %v720_v58 }
 0x3be   :  { %v2228_v54 = vpop.f32.mrb[23].mxu1  ;;  %2956 = vxpose.xlu0.b32.end [16/16] (narrow) %v5875_v20, 8 }
 0x3bf   :  { %3108 = vxpose.xlu1.b32.cont [8/16] (narrow) %v4118_v11, 8  ;;  %v724_v62 = vpop.trf.xlu0  ;;  %v744_v11 = vpop.trf.xlu1 }
 0x3c0   :  { %4288 = vmatmul.mubr.msk.f32.gmra.mrb[128].mxu1 %vm760_vm0, %v721_v8 }
 0x3c1   :  { %v4133_v28 = vpop.f32.mrb[24].mxu1  ;;  %4290 = vmatprep.mubr.msk.f32.mxu1 %vm760_vm0, %v722_v7 }
 0x3c2   :  { %v2238_v27 = vpop.f32.mrb[25].mxu1 }
 0x3c3   :  { %3109 = vxpose.xlu1.b32.cont [9/16] (narrow) %v2198_v38, 8  ;;  %3133 = vxpose.xlu0.b32.start [1/16] (narrow) %v2238_v27, 8  ;;  %v725_v41 = vpop.trf.xlu0  ;;  %v745_v7 = vpop.trf.xlu1 }
 0x3c4   :  { %4291 = vmatmul.mubr.msk.f32.gmra.mrb[130].mxu1 %vm760_vm0, %v723_v0 }
 0x3c5   :  { %v4136_v43 = vpop.f32.mrb[26].mxu1  ;;  %4293 = vmatprep.mubr.msk.f32.mxu1 %vm760_vm0, %v724_v62 }
 0x3c6   :  { %v2248_v35 = vpop.f32.mrb[27].mxu1 }
 0x3c7   :  { %3110 = vxpose.xlu1.b32.cont [10/16] (narrow) %v4121_v14, 8  ;;  %3134 = vxpose.xlu0.b32.cont [2/16] (narrow) %v4133_v28, 8  ;;  %v726_v53 = vpop.trf.xlu0  ;;  %v746_v14 = vpop.trf.xlu1 }
 0x3c8   :  { %4294 = vmatmul.mubr.msk.f32.gmra.mrb[132].mxu1 %vm760_vm0, %v725_v41 }
 0x3c9   :  { %v4139_v58 = vpop.f32.mrb[28].mxu1  ;;  %4296 = vmatprep.mubr.msk.f32.mxu1 %vm760_vm0, %v726_v53 }
 0x3ca   :  { %v2258_v8 = vpop.f32.mrb[29].mxu1 }
 0x3cb   :  { %3111 = vxpose.xlu1.b32.cont [11/16] (narrow) %v2208_v30, 8  ;;  %3135 = vxpose.xlu0.b32.cont [3/16] (narrow) %v2248_v35, 8  ;;  %v727_v38 = vpop.trf.xlu0  ;;  %v747_v30 = vpop.trf.xlu1 }
 0x3cc   :  { %4297 = vmatmul.mubr.msk.f32.gmra.mrb[134].mxu1 %vm760_vm0, %v727_v38 }
 0x3cd   :  { %v4142_v0 = vpop.f32.mrb[30].mxu1  ;;  %4299 = vmatprep.mubr.msk.f32.mxu1 %vm760_vm0, %v744_v11 }
 0x3ce   :  { %v2268_v20 = vpop.f32.mrb[31].mxu1 }
 0x3cf   :  { %3112 = vxpose.xlu1.b32.cont [12/16] (narrow) %v4124_v29, 8  ;;  %3136 = vxpose.xlu0.b32.cont [4/16] (narrow) %v4136_v43, 8  ;;  %v748_v35 = vpop.trf.xlu1 }
 0x3d0   :  { %4300 = vmatmul.mubr.msk.f32.gmra.mrb[136].mxu1 %vm760_vm0, %v745_v7 }
 0x3d1   :  { %v4145_v62 = vpop.f32.mrb[32].mxu1  ;;  %4302 = vmatprep.mubr.msk.f32.mxu1 %vm760_vm0, %v746_v14 }
 0x3d2   :  { %v2278_v28 = vpop.f32.mrb[33].mxu1 }
 0x3d3   :  { %3113 = vxpose.xlu1.b32.cont [13/16] (narrow) %v2218_v23, 8  ;;  %3137 = vxpose.xlu0.b32.cont [5/16] (narrow) %v2258_v8, 8  ;;  %v749_v53 = vpop.trf.xlu1 }
 0x3d4   :  { %4303 = vmatmul.mubr.msk.f32.gmra.mrb[138].mxu1 %vm760_vm0, %v747_v30 }
 0x3d5   :  { %v4148_v27 = vpop.f32.mrb[34].mxu1  ;;  %4305 = vmatprep.mubr.msk.f32.mxu1 %vm760_vm0, %v748_v35 }
 0x3d6   :  { %v2288_v41 = vpop.f32.mrb[35].mxu1 }
 0x3d7   :  { %3114 = vxpose.xlu1.b32.cont [14/16] (narrow) %v4127_v25, 8  ;;  %3138 = vxpose.xlu0.b32.cont [6/16] (narrow) %v4139_v58, 8  ;;  %v750_v8 = vpop.trf.xlu1 }
 0x3d8   :  { %4306 = vmatmul.mubr.msk.f32.gmra.mrb[140].mxu1 %vm760_vm0, %v749_v53 }
 0x3d9   :  { %v4151_v29 = vpop.f32.mrb[36].mxu1  ;;  %4308 = vmatprep.mubr.msk.f32.mxu1 %vm760_vm0, %v750_v8 }
 0x3da   :  { %v2298_v43 = vpop.f32.mrb[37].mxu1 }
 0x3db   :  { %3115 = vxpose.xlu1.b32.cont [15/16] (narrow) %v2228_v54, 8  ;;  %3139 = vxpose.xlu0.b32.cont [7/16] (narrow) %v2268_v20, 8  ;;  %v751_v58 = vpop.trf.xlu1 }
 0x3dc   :  { %4309 = vmatmul.mubr.msk.f32.gmra.mrb[142].mxu1 %vm760_vm0, %v751_v58 }
 0x3dd   :  { %v4154_v11 = vpop.f32.mrb[38].mxu1 }
 0x3de   :  { %v2308_v23 = vpop.f32.mrb[39].mxu1 }
 0x3df   :  { %3116 = vxpose.xlu1.b32.end [16/16] (narrow) %v4130_v22, 8  ;;  %3140 = vxpose.xlu0.b32.cont [8/16] (narrow) %v4142_v0, 8  ;;  %v752_v22 = vpop.trf.xlu1 }
 0x3e0   :  { %4311 = vmatprep.mubr.msk.f32.mxu1 %vm760_vm0, %v752_v22 }
 0x3e1   :  { %v5415_v38 = vpop.f32.mrb[40].mxu1 }
 0x3e2   :  { %v5417_v25 = vpop.f32.mrb[41].mxu1 }
 0x3e3   :  { %3141 = vxpose.xlu0.b32.cont [9/16] (narrow) %v2278_v28, 8  ;;  %2973 = vxpose.xlu1.b32.start [1/16] (narrow) %v5114_v47, 8  ;;  %v753_v47 = vpop.trf.xlu1 }
 0x3e4   :  { %4312 = vmatmul.mubr.msk.f32.gmra.mrb[144].mxu1 %vm760_vm0, %v753_v47 }
 0x3e5   :  { %v5421_v54 = vpop.f32.mrb[42].mxu1 }
 0x3e6   :  { %v5423_v7 = vpop.f32.mrb[43].mxu1 }
 0x3e7   :  { %3142 = vxpose.xlu0.b32.cont [10/16] (narrow) %v4145_v62, 8  ;;  %2974 = vxpose.xlu1.b32.cont [2/16] (narrow) %v5109_v37, 8  ;;  %v5876_v62 = vld [vmem:[#allocation18_spill] sm:$0xff]  ;;  %v754_v37 = vpop.trf.xlu1 }
 0x3e8   :  { %4314 = vmatprep.mubr.msk.f32.mxu1 %vm760_vm0, %v754_v37 }
 0x3e9   :  { %v5427_v0 = vpop.f32.mrb[44].mxu1 }
 0x3ea   :  { %v5429_v20 = vpop.f32.mrb[45].mxu1 }
 0x3eb   :  { %3143 = vxpose.xlu0.b32.cont [11/16] (narrow) %v2288_v41, 8  ;;  %2975 = vxpose.xlu1.b32.cont [3/16] (narrow) %v5124_v10, 8  ;;  %v755_v10 = vpop.trf.xlu1 }
 0x3ec   :  { %4315 = vmatmul.mubr.msk.f32.gmra.mrb[146].mxu1 %vm760_vm0, %v755_v10 }
 0x3ed   :  { %v5433_v14 = vpop.f32.mrb[46].mxu1 }
 0x3ee   :  { %v5435_v28 = vpop.f32.mrb[47].mxu1 }
 0x3ef   :  { %3144 = vxpose.xlu0.b32.cont [12/16] (narrow) %v4148_v27, 8  ;;  %2976 = vxpose.xlu1.b32.cont [4/16] (narrow) %v5876_v62, 8  ;;  %v756_v27 = vpop.trf.xlu1 }
 0x3f0   :  { %4317 = vmatprep.mubr.msk.f32.mxu1 %vm760_vm0, %v756_v27 }
 0x3f1   :  { %v5439_v30 = vpop.f32.mrb[48].mxu1 }
 0x3f2   :  { %v5441_v35 = vpop.f32.mrb[49].mxu1 }
 0x3f3   :  { %3145 = vxpose.xlu0.b32.cont [13/16] (narrow) %v2298_v43, 8  ;;  %2977 = vxpose.xlu1.b32.cont [5/16] (narrow) %v5132_v33, 8  ;;  %v757_v33 = vpop.trf.xlu1 }
 0x3f4   :  { %4318 = vmatmul.mubr.msk.f32.gmra.mrb[148].mxu1 %vm760_vm0, %v757_v33  ;;  %v5882_v33 = vld [vmem:[#allocation24_spill] sm:$0xff] }
 0x3f5   :  { %v5445_v41 = vpop.f32.mrb[50].mxu1 }
 0x3f6   :  { %v5447_v53 = vpop.f32.mrb[51].mxu1 }
 0x3f7   :  { %3146 = vxpose.xlu0.b32.cont [14/16] (narrow) %v4151_v29, 8  ;;  %2978 = vxpose.xlu1.b32.cont [6/16] (narrow) %v5128_v51, 8  ;;  %v758_v51 = vpop.trf.xlu1 }
 0x3f8   :  { %4320 = vmatprep.mubr.msk.f32.mxu1 %vm760_vm0, %v758_v51 }
 0x3f9   :  { %v5451_v8 = vpop.f32.mrb[52].mxu1 }
 0x3fa   :  { %v5453_v58 = vpop.f32.mrb[53].mxu1 }
 0x3fb   :  { %3147 = vxpose.xlu0.b32.cont [15/16] (narrow) %v2308_v23, 8  ;;  %2979 = vxpose.xlu1.b32.cont [7/16] (narrow) %v5141_v55, 8  ;;  %v759_v55 = vpop.trf.xlu1 }
 0x3fc   :  { %4321 = vmatmul.mubr.msk.f32.gmra.mrb[150].mxu1 %vm760_vm0, %v759_v55 }
 0x3fd   :  { %v5457_v43 = vpop.f32.mrb[54].mxu1 }
 0x3fe   :  { %v5459_v22 = vpop.f32.mrb[55].mxu1 }
 0x3ff   :  { %3148 = vxpose.xlu0.b32.end [16/16] (narrow) %v4154_v11, 8  ;;  %2980 = vxpose.xlu1.b32.cont [8/16] (narrow) %v5137_v50, 8 }
 0x401   :  { %v5463_v29 = vpop.f32.mrb[56].mxu1 }
 0x402   :  { %v5465_v47 = vpop.f32.mrb[57].mxu1 }
 0x403   :  { %2981 = vxpose.xlu1.b32.cont [9/16] (narrow) %v5153_v56, 8  ;;  %3005 = vxpose.xlu0.b32.start [1/16] (narrow) %v5201_v59, 8 }
 0x405   :  { %v5470_v23 = vpop.f32.mrb[58].mxu1 }
 0x406   :  { %v5472_v62 = vpop.f32.mrb[59].mxu1 }
 0x407   :  { %2982 = vxpose.xlu1.b32.cont [10/16] (narrow) %v5147_v34, 8  ;;  %3006 = vxpose.xlu0.b32.cont [2/16] (narrow) %v5195_v44, 8 }
 0x409   :  { %v5476_v50 = vpop.f32.mrb[60].mxu1 }
 0x40a   :  { %v5478_v11 = vpop.f32.mrb[61].mxu1 }
 0x40b   :  { %2983 = vxpose.xlu1.b32.cont [11/16] (narrow) %v5165_v6, 8  ;;  %3007 = vxpose.xlu0.b32.cont [3/16] (narrow) %v5213_v9, 8 }
 0x40d   :  { %v5482_v56 = vpop.f32.mrb[62].mxu1 }
 0x40e   :  { %v5484_v59 = vpop.f32.mrb[63].mxu1 }
 0x40f   :  { %2984 = vxpose.xlu1.b32.cont [12/16] (narrow) %v5159_v13, 8  ;;  %3008 = vxpose.xlu0.b32.cont [4/16] (narrow) %v5207_v2, 8 }
 0x411   :  { %v5488_v37 = vpop.f32.mrb[64].mxu1 }
 0x412   :  { %v5490_v34 = vpop.f32.mrb[65].mxu1 }
 0x413   :  { %2985 = vxpose.xlu1.b32.cont [13/16] (narrow) %v5177_v4, 8  ;;  %3009 = vxpose.xlu0.b32.cont [5/16] (narrow) %v5222_v45, 8 }
 0x415   :  { %v5494_v44 = vpop.f32.mrb[66].mxu1 }
 0x416   :  { %v5496_v6 = vpop.f32.mrb[67].mxu1 }
 0x417   :  { %2986 = vxpose.xlu1.b32.cont [14/16] (narrow) %v5171_v18, 8  ;;  %3010 = vxpose.xlu0.b32.cont [6/16] (narrow) %v5218_v63, 8 }
 0x41a   :  { %v5500_v9 = vpop.f32.mrb[68].mxu1 }
 0x41b   :  { %2987 = vxpose.xlu1.b32.cont [15/16] (narrow) %v5189_v61, 8  ;;  %3011 = vxpose.xlu0.b32.cont [7/16] (narrow) %v5232_v42, 8  ;;  %v5504_v13 = vpop.f32.mrb[69].mxu1 }
 0x41e   :  { %v5506_v2 = vpop.f32.mrb[70].mxu1 }
 0x41f   :  { %2988 = vxpose.xlu1.b32.end [16/16] (narrow) %v5183_v31, 8  ;;  %3012 = vxpose.xlu0.b32.cont [8/16] (narrow) %v5228_v12, 8  ;;  %v5510_v4 = vpop.f32.mrb[71].mxu1 }
 0x422   :  { %v5512_v45 = vpop.f32.mrb[72].mxu1 }
 0x423   :  { %3165 = vxpose.xlu1.b32.start [1/16] (narrow) %v5417_v25, 8  ;;  %3013 = vxpose.xlu0.b32.cont [9/16] (narrow) %v5242_v19, 8  ;;  %v5516_v18 = vpop.f32.mrb[73].mxu1 }
 0x426   :  { %v5518_v61 = vpop.f32.mrb[74].mxu1 }
 0x427   :  { %3166 = vxpose.xlu1.b32.cont [2/16] (narrow) %v5415_v38, 8  ;;  %3014 = vxpose.xlu0.b32.cont [10/16] (narrow) %v5236_v57, 8  ;;  %v5522_v63 = vpop.f32.mrb[75].mxu1 }
 0x42a   :  { %v5524_v31 = vpop.f32.mrb[76].mxu1 }
 0x42b   :  { %3167 = vxpose.xlu1.b32.cont [3/16] (narrow) %v5423_v7, 8  ;;  %3015 = vxpose.xlu0.b32.cont [11/16] (narrow) %v5250_v26, 8  ;;  %v5528_v12 = vpop.f32.mrb[77].mxu1 }
 0x42e   :  { %v5530_v42 = vpop.f32.mrb[78].mxu1 }
 0x42f   :  { %3168 = vxpose.xlu1.b32.cont [4/16] (narrow) %v5421_v54, 8  ;;  %3016 = vxpose.xlu0.b32.cont [12/16] (narrow) %v5246_v5, 8  ;;  %v5534_v19 = vpop.f32.mrb[79].mxu1 }
 0x432   :  { %v5536_v38 = vpop.f32.mrb[80].mxu1 }
 0x433   :  { %3169 = vxpose.xlu1.b32.cont [5/16] (narrow) %v5429_v20, 8  ;;  %3017 = vxpose.xlu0.b32.cont [13/16] (narrow) %v5260_v39, 8  ;;  %v5540_v57 = vpop.f32.mrb[81].mxu1 }
 0x436   :  { %v5542_v25 = vpop.f32.mrb[82].mxu1 }
 0x437   :  { %3170 = vxpose.xlu1.b32.cont [6/16] (narrow) %v5427_v0, 8  ;;  %3018 = vxpose.xlu0.b32.cont [14/16] (narrow) %v5256_v3, 8  ;;  %v5546_v26 = vpop.f32.mrb[83].mxu1 }
 0x43a   :  { %v5548_v54 = vpop.f32.mrb[84].mxu1 }
 0x43b   :  { %3171 = vxpose.xlu1.b32.cont [7/16] (narrow) %v5435_v28, 8  ;;  %3019 = vxpose.xlu0.b32.cont [15/16] (narrow) %v5270_v49, 8  ;;  %v5552_v5 = vpop.f32.mrb[85].mxu1 }
 0x43e   :  { %v5554_v7 = vpop.f32.mrb[86].mxu1 }
 0x43f   :  { %3172 = vxpose.xlu1.b32.cont [8/16] (narrow) %v5433_v14, 8  ;;  %3020 = vxpose.xlu0.b32.end [16/16] (narrow) %v5264_v16, 8  ;;  %v5558_v39 = vpop.f32.mrb[87].mxu1 }
 0x442   :  { %v5560_v0 = vpop.f32.mrb[88].mxu1 }
 0x443   :  { %3173 = vxpose.xlu1.b32.cont [9/16] (narrow) %v5441_v35, 8  ;;  %3069 = vxpose.xlu0.b32.start [1/16] (narrow) %v5364_v21, 8  ;;  %v5564_v3 = vpop.f32.mrb[89].mxu1 }
 0x446   :  { %v5566_v20 = vpop.f32.mrb[90].mxu1 }
 0x447   :  { %3174 = vxpose.xlu1.b32.cont [10/16] (narrow) %v5439_v30, 8  ;;  %3070 = vxpose.xlu0.b32.cont [2/16] (narrow) %v5360_v36, 8  ;;  %v5570_v49 = vpop.f32.mrb[91].mxu1 }
 0x44a   :  { %v5572_v14 = vpop.f32.mrb[92].mxu1 }
 0x44b   :  { %3175 = vxpose.xlu1.b32.cont [11/16] (narrow) %v5447_v53, 8  ;;  %3071 = vxpose.xlu0.b32.cont [3/16] (narrow) %v5371_v1, 8  ;;  %v5576_v16 = vpop.f32.mrb[93].mxu1 }
 0x44e   :  { %v5578_v28 = vpop.f32.mrb[94].mxu1 }
 0x44f   :  { %3176 = vxpose.xlu1.b32.cont [12/16] (narrow) %v5445_v41, 8  ;;  %3072 = vxpose.xlu0.b32.cont [4/16] (narrow) %v5367_v52, 8  ;;  %v5582_v21 = vpop.f32.mrb[95].mxu1 }
 0x452   :  { %v5584_v30 = vpop.f32.mrb[96].mxu1 }
 0x453   :  { %3177 = vxpose.xlu1.b32.cont [13/16] (narrow) %v5453_v58, 8  ;;  %3073 = vxpose.xlu0.b32.cont [5/16] (narrow) %v5378_v15, 8  ;;  %v5588_v36 = vpop.f32.mrb[97].mxu1 }
 0x456   :  { %v5590_v35 = vpop.f32.mrb[98].mxu1 }
 0x457   :  { %3178 = vxpose.xlu1.b32.cont [14/16] (narrow) %v5451_v8, 8  ;;  %3074 = vxpose.xlu0.b32.cont [6/16] (narrow) %v5374_v32, 8  ;;  %v5594_v1 = vpop.f32.mrb[99].mxu1  ;;  %v5880_v8 = vld [vmem:[#allocation25_spill] sm:$0xff] }
 0x45a   :  { %v5596_v10 = vpop.f32.mrb[100].mxu1 }
 0x45b   :  { %3179 = vxpose.xlu1.b32.cont [15/16] (narrow) %v5459_v22, 8  ;;  %3075 = vxpose.xlu0.b32.cont [7/16] (narrow) %v5386_v24, 8  ;;  %v5600_v52 = vpop.f32.mrb[101].mxu1  ;;  %v5885_v22 = vld [vmem:[#allocation31_spill] sm:$0xff] }
 0x45f   :  { %3180 = vxpose.xlu1.b32.end [16/16] (narrow) %v5457_v43, 8  ;;  %3076 = vxpose.xlu0.b32.cont [8/16] (narrow) %v5381_v46, 8  ;;  %v5604_v15 = vpop.f32.mrb[102].mxu1  ;;  %v5879_v46 = vld [vmem:[#allocation20_spill] sm:$0xff] }
 0x460   :  { %5877 = vst [vmem:[#allocation12_spill] sm:$0xff] %v5604_v15  ;;  %v5606_v41 = vpop.f32.mrb[103].mxu1 }
 0x461   :  { %5878 = vst [vmem:[#allocation14_spill] sm:$0xff] %v5606_v41 }
 0x463   :  { %3037 = vxpose.xlu1.b32.start [1/16] (narrow) %v5278_v48, 8  ;;  %3077 = vxpose.xlu0.b32.cont [9/16] (narrow) %v5286_v17, 8  ;;  %v5610_v32 = vpop.f32.mrb[104].mxu1  ;;  %v5881_v17 = vld [vmem:[#allocation19_spill] sm:$0xff] }
 0x464   :  { %v5612_v53 = vpop.f32.mrb[105].mxu1 }
 0x467   :  { %3038 = vxpose.xlu1.b32.cont [2/16] (narrow) %v5274_v40, 8  ;;  %3078 = vxpose.xlu0.b32.cont [10/16] (narrow) %v5284_v60, 8  ;;  %v5616_v24 = vpop.f32.mrb[106].mxu1  ;;  %v5884_v60 = vld [vmem:[#allocation22_spill] sm:$0xff] }
 0x468   :  { %v5618_v27 = vpop.f32.mrb[107].mxu1 }
 0x46b   :  { %3039 = vxpose.xlu1.b32.cont [3/16] (narrow) %v5879_v46, 8  ;;  %3079 = vxpose.xlu0.b32.cont [11/16] (narrow) %v5880_v8, 8  ;;  %v5622_v58 = vpop.f32.mrb[108].mxu1  ;;  %v5888_v46 = vld [vmem:[#allocation21_spill] sm:$0xff]  ;;  %v5889_v8 = vld [vmem:[#allocation30_spill] sm:$0xff] }
 0x46c   :  { %v5624_v48 = vpop.f32.mrb[109].mxu1 }
 0x46f   :  { %3040 = vxpose.xlu1.b32.cont [4/16] (narrow) %v5881_v17, 8  ;;  %3080 = vxpose.xlu0.b32.cont [12/16] (narrow) %v5882_v33, 8  ;;  %v5628_v43 = vpop.f32.mrb[110].mxu1  ;;  %v5891_v33 = vld [vmem:[#allocation26_spill] sm:$0xff] }
 0x470   :  { %5883 = vst [vmem:[#allocation13_spill] sm:$0xff] %v5628_v43  ;;  %v5630_v40 = vpop.f32.mrb[111].mxu1  ;;  %v5892_v43 = vld [vmem:[#allocation37_spill] sm:$0xff] }
 0x473   :  { %3041 = vxpose.xlu1.b32.cont [5/16] (narrow) %v5884_v60, 8  ;;  %3081 = vxpose.xlu0.b32.cont [13/16] (narrow) %v5885_v22, 8  ;;  %v5634_v51 = vpop.f32.mrb[112].mxu1  ;;  %v5895_v22 = vld [vmem:[#allocation23_spill] sm:$0xff] }
 0x474   :  { %5886 = vst [vmem:[#allocation15_spill] sm:$0xff] %v5634_v51  ;;  %v5636_v55 = vpop.f32.mrb[113].mxu1  ;;  %v5896_v51 = vld [vmem:[#allocation36_spill] sm:$0xff] }
 0x475   :  { %5887 = vst [vmem:[#allocation17_spill] sm:$0xff] %v5636_v55 }
 0x477   :  { %3042 = vxpose.xlu1.b32.cont [6/16] (narrow) %v5888_v46, 8  ;;  %3082 = vxpose.xlu0.b32.cont [14/16] (narrow) %v5889_v8, 8  ;;  %v5640_v15 = vpop.f32.mrb[114].mxu1  ;;  %v5899_v8 = vld [vmem:[#allocation28_spill] sm:$0xff] }
 0x478   :  { %5890 = vst [vmem:[#allocation16_spill] sm:$0xff] %v5640_v15  ;;  %v5642_v17 = vpop.f32.mrb[115].mxu1 }
 0x47b   :  { %3043 = vxpose.xlu1.b32.cont [7/16] (narrow) %v5891_v33, 8  ;;  %3083 = vxpose.xlu0.b32.cont [15/16] (narrow) %v5892_v43, 8  ;;  %v5646_v41 = vpop.f32.mrb[116].mxu1  ;;  %v5900_v43 = vld [vmem:[#allocation27_spill] sm:$0xff] }
 0x47c   :  { %5893 = vst [vmem:[#allocation18_spill] sm:$0xff] %v5646_v41  ;;  %v5648_v60 = vpop.f32.mrb[117].mxu1 }
 0x47d   :  { %5894 = vst [vmem:[#allocation20_spill] sm:$0xff] %v5648_v60 }
 0x47f   :  { %3044 = vxpose.xlu1.b32.cont [8/16] (narrow) %v5895_v22, 8  ;;  %3084 = vxpose.xlu0.b32.end [16/16] (narrow) %v5896_v51, 8  ;;  %v5652_v55 = vpop.f32.mrb[118].mxu1  ;;  %v5901_v51 = vld [vmem:[#allocation32_spill] sm:$0xff] }
 0x480   :  { %5897 = vst [vmem:[#allocation25_spill] sm:$0xff] %v5652_v55  ;;  %v5654_v46 = vpop.f32.mrb[119].mxu1 }
 0x481   :  { %5898 = vst [vmem:[#allocation19_spill] sm:$0xff] %v5654_v46 }
 0x483   :  { %3045 = vxpose.xlu1.b32.cont [9/16] (narrow) %v5899_v8, 8  ;;  %3197 = vxpose.xlu0.b32.start [1/16] (narrow) %v5465_v47, 8  ;;  %v5658_v15 = vpop.f32.mrb[120].mxu1  ;;  %v5903_v47 = vld [vmem:[#allocation29_spill] sm:$0xff] }
 0x484   :  { %v5660_v33 = vpop.f32.mrb[121].mxu1 }
 0x487   :  { %3046 = vxpose.xlu1.b32.cont [10/16] (narrow) %v5900_v43, 8  ;;  %3198 = vxpose.xlu0.b32.cont [2/16] (narrow) %v5463_v29, 8  ;;  %v5664_v41 = vpop.f32.mrb[122].mxu1  ;;  %v5905_v29 = vld [vmem:[#allocation34_spill] sm:$0xff] }
 0x488   :  { %v5666_v22 = vpop.f32.mrb[123].mxu1 }
 0x48b   :  { %3047 = vxpose.xlu1.b32.cont [11/16] (narrow) %v5901_v51, 8  ;;  %3199 = vxpose.xlu0.b32.cont [3/16] (narrow) %v5472_v62, 8  ;;  %v5670_v55 = vpop.f32.mrb[124].mxu1  ;;  %v5907_v62 = vld [vmem:[#allocation33_spill] sm:$0xff] }
 0x48c   :  { %5902 = vst [vmem:[#allocation24_spill] sm:$0xff] %v5670_v55  ;;  %v5672_v8 = vpop.f32.mrb[125].mxu1 }
 0x48f   :  { %3048 = vxpose.xlu1.b32.cont [12/16] (narrow) %v5903_v47, 8  ;;  %3200 = vxpose.xlu0.b32.cont [4/16] (narrow) %v5470_v23, 8  ;;  %v5676_v46 = vpop.f32.mrb[126].mxu1  ;;  %v5908_v23 = vld [vmem:[#allocation38_spill] sm:$0xff] }
 0x490   :  { %5904 = vst [vmem:[#allocation22_spill] sm:$0xff] %v5676_v46  ;;  %v5678_v43 = vpop.f32.mrb[127].mxu1 }
 0x493   :  { %3049 = vxpose.xlu1.b32.cont [13/16] (narrow) %v5905_v29, 8  ;;  %3201 = vxpose.xlu0.b32.cont [5/16] (narrow) %v5478_v11, 8  ;;  %v5682_v60 = vpop.f32.mrb[128].mxu1  ;;  %v5909_v11 = vld [vmem:[#allocation35_spill] sm:$0xff] }
 0x494   :  { %5906 = vst [vmem:[#allocation31_spill] sm:$0xff] %v5682_v60  ;;  %v5684_v51 = vpop.f32.mrb[129].mxu1 }
 0x497   :  { %3050 = vxpose.xlu1.b32.cont [14/16] (narrow) %v5907_v62, 8  ;;  %3202 = vxpose.xlu0.b32.cont [6/16] (narrow) %v5476_v50, 8  ;;  %v5688_v55 = vpop.f32.mrb[130].mxu1 }
 0x498   :  { %v5690_v47 = vpop.f32.mrb[131].mxu1 }
 0x49b   :  { %3051 = vxpose.xlu1.b32.cont [15/16] (narrow) %v5908_v23, 8  ;;  %3203 = vxpose.xlu0.b32.cont [7/16] (narrow) %v5484_v59, 8  ;;  %v5694_v46 = vpop.f32.mrb[132].mxu1 }
 0x49c   :  { %v5696_v29 = vpop.f32.mrb[133].mxu1 }
 0x49f   :  { %3052 = vxpose.xlu1.b32.end [16/16] (narrow) %v5909_v11, 8  ;;  %3204 = vxpose.xlu0.b32.cont [8/16] (narrow) %v5482_v56, 8  ;;  %v5700_v60 = vpop.f32.mrb[134].mxu1 }
 0x4a0   :  { %v5702_v62 = vpop.f32.mrb[135].mxu1 }
 0x4a3   :  { %3229 = vxpose.xlu1.b32.start [1/16] (narrow) %v5516_v18, 8  ;;  %3205 = vxpose.xlu0.b32.cont [9/16] (narrow) %v5490_v34, 8  ;;  %v5706_v50 = vpop.f32.mrb[136].mxu1 }
 0x4a4   :  { %v5708_v23 = vpop.f32.mrb[137].mxu1 }
 0x4a7   :  { %3230 = vxpose.xlu1.b32.cont [2/16] (narrow) %v5512_v45, 8  ;;  %3206 = vxpose.xlu0.b32.cont [10/16] (narrow) %v5488_v37, 8  ;;  %v5712_v59 = vpop.f32.mrb[138].mxu1 }
 0x4a8   :  { %v5714_v11 = vpop.f32.mrb[139].mxu1 }
 0x4ab   :  { %3231 = vxpose.xlu1.b32.cont [3/16] (narrow) %v5522_v63, 8  ;;  %3207 = vxpose.xlu0.b32.cont [11/16] (narrow) %v5496_v6, 8  ;;  %v5720_v56 = vpop.f32.mrb[140].mxu1  ;;  %v2893_v63 = vpop.trf.xlu0 }
 0x4ac   :  { %v5722_v34 = vpop.f32.mrb[141].mxu1  ;;  %3389 = vst [vmem:[#allocation8] sm:$0xff] %v2893_v63 }
 0x4af   :  { %3232 = vxpose.xlu1.b32.cont [4/16] (narrow) %v5518_v61, 8  ;;  %3208 = vxpose.xlu0.b32.cont [12/16] (narrow) %v5494_v44, 8  ;;  %v5728_v37 = vpop.f32.mrb[142].mxu1 }
 0x4b0   :  { %v5730_v45 = vpop.f32.mrb[143].mxu1 }
 0x4b3   :  { %3233 = vxpose.xlu1.b32.cont [5/16] (narrow) %v5528_v12, 8  ;;  %3209 = vxpose.xlu0.b32.cont [13/16] (narrow) %v5504_v13, 8 }
 0x4b7   :  { %3234 = vxpose.xlu1.b32.cont [6/16] (narrow) %v5524_v31, 8  ;;  %3210 = vxpose.xlu0.b32.cont [14/16] (narrow) %v5500_v9, 8  ;;  %v5736_v44 = vpop.f32.mrb[144].mxu1  ;;  %v2925_v31 = vpop.trf.xlu1 }
 0x4b8   :  { %v5738_v6 = vpop.f32.mrb[145].mxu1  ;;  %3390 = vst [vmem:[#allocation8 + $0x8] sm:$0xff] %v2925_v31 }
 0x4bb   :  { %3235 = vxpose.xlu1.b32.cont [7/16] (narrow) %v5534_v19, 8  ;;  %3211 = vxpose.xlu0.b32.cont [15/16] (narrow) %v5510_v4, 8  ;;  %v3117_v12 = vpop.trf.xlu1 }
 0x4bc   :  { %3396 = vst [vmem:[#allocation8 + $0x38] sm:$0xff] %v3117_v12 }
 0x4bf   :  { %3236 = vxpose.xlu1.b32.cont [8/16] (narrow) %v5530_v42, 8  ;;  %3212 = vxpose.xlu0.b32.end [16/16] (narrow) %v5506_v2, 8  ;;  %v5744_v9 = vpop.f32.mrb[146].mxu1  ;;  %v2957_v42 = vpop.trf.xlu0 }
 0x4c0   :  { %v5746_v13 = vpop.f32.mrb[147].mxu1  ;;  %3391 = vst [vmem:[#allocation8 + $0x10] sm:$0xff] %v2957_v42 }
 0x4c3   :  { %3237 = vxpose.xlu1.b32.cont [9/16] (narrow) %v5540_v57, 8  ;;  %3261 = vxpose.xlu0.b32.start [1/16] (narrow) %v5564_v3, 8  ;;  %v3149_v19 = vpop.trf.xlu0 }
 0x4c4   :  { %3397 = vst [vmem:[#allocation8 + $0x40] sm:$0xff] %v3149_v19 }
 0x4c7   :  { %3238 = vxpose.xlu1.b32.cont [10/16] (narrow) %v5536_v38, 8  ;;  %3262 = vxpose.xlu0.b32.cont [2/16] (narrow) %v5560_v0, 8  ;;  %v5752_v2 = vpop.f32.mrb[148].mxu1  ;;  %v2989_v38 = vpop.trf.xlu1  ;;  %v5913_v0 = vld [vmem:[#allocation17_spill] sm:$0xff] }
 0x4c8   :  { %v5754_v4 = vpop.f32.mrb[149].mxu1  ;;  %3392 = vst [vmem:[#allocation8 + $0x18] sm:$0xff] %v2989_v38 }
 0x4cb   :  { %3239 = vxpose.xlu1.b32.cont [11/16] (narrow) %v5546_v26, 8  ;;  %3263 = vxpose.xlu0.b32.cont [3/16] (narrow) %v5570_v49, 8  ;;  %v3181_v57 = vpop.trf.xlu1  ;;  %v5915_v49 = vld [vmem:[#allocation16_spill] sm:$0xff] }
 0x4cc   :  { %3398 = vst [vmem:[#allocation8 + $0x48] sm:$0xff] %v3181_v57 }
 0x4cf   :  { %3240 = vxpose.xlu1.b32.cont [12/16] (narrow) %v5542_v25, 8  ;;  %3264 = vxpose.xlu0.b32.cont [4/16] (narrow) %v5566_v20, 8  ;;  %v5760_v18 = vpop.f32.mrb[150].mxu1  ;;  %v3021_v25 = vpop.trf.xlu0  ;;  %v5914_v20 = vld [vmem:[#allocation15_spill] sm:$0xff] }
 0x4d0   :  { %v5762_v61 = vpop.f32.mrb[151].mxu1  ;;  %3393 = vst [vmem:[#allocation8 + $0x20] sm:$0xff] %v3021_v25 }
 0x4d3   :  { %3241 = vxpose.xlu1.b32.cont [13/16] (narrow) %v5552_v5, 8  ;;  %3265 = vxpose.xlu0.b32.cont [5/16] (narrow) %v5576_v16, 8  ;;  %v5910_v5 = vld [vmem:[#allocation14_spill] sm:$0xff] }
 0x4d4   :  { %v5917_v16 = vld [vmem:[#allocation18_spill] sm:$0xff] }
 0x4d7   :  { %3242 = vxpose.xlu1.b32.cont [14/16] (narrow) %v5548_v54, 8  ;;  %3266 = vxpose.xlu0.b32.cont [6/16] (narrow) %v5572_v14, 8  ;;  %v3085_v54 = vpop.trf.xlu0  ;;  %v5916_v14 = vld [vmem:[#allocation20_spill] sm:$0xff] }
 0x4d8   :  { %3395 = vst [vmem:[#allocation8 + $0x30] sm:$0xff] %v3085_v54 }
 0x4db   :  { %3243 = vxpose.xlu1.b32.cont [15/16] (narrow) %v5558_v39, 8  ;;  %3267 = vxpose.xlu0.b32.cont [7/16] (narrow) %v5582_v21, 8  ;;  %v5912_v39 = vld [vmem:[#allocation12_spill] sm:$0xff]  ;;  %v5919_v21 = vld [vmem:[#allocation19_spill] sm:$0xff] }
 0x4df   :  { %3244 = vxpose.xlu1.b32.end [16/16] (narrow) %v5554_v7, 8  ;;  %3268 = vxpose.xlu0.b32.cont [8/16] (narrow) %v5578_v28, 8  ;;  %v5911_v7 = vld [vmem:[#allocation13_spill] sm:$0xff]  ;;  %v5918_v28 = vld [vmem:[#allocation24_spill] sm:$0xff] }
 0x4e3   :  { %3293 = vxpose.xlu1.b32.start [1/16] (narrow) %v5612_v53, 8  ;;  %3269 = vxpose.xlu0.b32.cont [9/16] (narrow) %v5588_v36, 8  ;;  %v3053_v26 = vpop.trf.xlu1  ;;  %v5921_v36 = vld [vmem:[#allocation22_spill] sm:$0xff] }
 0x4e4   :  { %3394 = vst [vmem:[#allocation8 + $0x28] sm:$0xff] %v3053_v26 }
 0x4e7   :  { %3294 = vxpose.xlu1.b32.cont [2/16] (narrow) %v5610_v32, 8  ;;  %3270 = vxpose.xlu0.b32.cont [10/16] (narrow) %v5584_v30, 8  ;;  %v5920_v30 = vld [vmem:[#allocation25_spill] sm:$0xff] }
 0x4eb   :  { %3295 = vxpose.xlu1.b32.cont [3/16] (narrow) %v5618_v27, 8  ;;  %3271 = vxpose.xlu0.b32.cont [11/16] (narrow) %v5594_v1, 8  ;;  %v5922_v1 = vld [vmem:[#allocation31_spill] sm:$0xff] }
 0x4ef   :  { %3296 = vxpose.xlu1.b32.cont [4/16] (narrow) %v5616_v24, 8  ;;  %3272 = vxpose.xlu0.b32.cont [12/16] (narrow) %v5590_v35, 8 }
 0x4f3   :  { %3297 = vxpose.xlu1.b32.cont [5/16] (narrow) %v5624_v48, 8  ;;  %3273 = vxpose.xlu0.b32.cont [13/16] (narrow) %v5600_v52, 8 }
 0x4f7   :  { %3298 = vxpose.xlu1.b32.cont [6/16] (narrow) %v5622_v58, 8  ;;  %3274 = vxpose.xlu0.b32.cont [14/16] (narrow) %v5596_v10, 8 }
 0x4fb   :  { %3299 = vxpose.xlu1.b32.cont [7/16] (narrow) %v5630_v40, 8  ;;  %3275 = vxpose.xlu0.b32.cont [15/16] (narrow) %v5910_v5, 8 }
 0x4ff   :  { %3300 = vxpose.xlu1.b32.cont [8/16] (narrow) %v5911_v7, 8  ;;  %3276 = vxpose.xlu0.b32.end [16/16] (narrow) %v5912_v39, 8 }
 0x503   :  { %3301 = vxpose.xlu1.b32.cont [9/16] (narrow) %v5913_v0, 8  ;;  %3325 = vxpose.xlu0.b32.start [1/16] (narrow) %v5660_v33, 8  ;;  %v3213_v3 = vpop.trf.xlu0 }
 0x504   :  { %3399 = vst [vmem:[#allocation8 + $0x50] sm:$0xff] %v3213_v3 }
 0x507   :  { %3302 = vxpose.xlu1.b32.cont [10/16] (narrow) %v5914_v20, 8  ;;  %3326 = vxpose.xlu0.b32.cont [2/16] (narrow) %v5658_v15, 8 }
 0x50b   :  { %3303 = vxpose.xlu1.b32.cont [11/16] (narrow) %v5642_v17, 8  ;;  %3327 = vxpose.xlu0.b32.cont [3/16] (narrow) %v5666_v22, 8 }
 0x50f   :  { %3304 = vxpose.xlu1.b32.cont [12/16] (narrow) %v5915_v49, 8  ;;  %3328 = vxpose.xlu0.b32.cont [4/16] (narrow) %v5664_v41, 8 }
 0x513   :  { %3305 = vxpose.xlu1.b32.cont [13/16] (narrow) %v5916_v14, 8  ;;  %3329 = vxpose.xlu0.b32.cont [5/16] (narrow) %v5672_v8, 8 }
 0x517   :  { %3306 = vxpose.xlu1.b32.cont [14/16] (narrow) %v5917_v16, 8  ;;  %3330 = vxpose.xlu0.b32.cont [6/16] (narrow) %v5918_v28, 8 }
 0x51b   :  { %3307 = vxpose.xlu1.b32.cont [15/16] (narrow) %v5919_v21, 8  ;;  %3331 = vxpose.xlu0.b32.cont [7/16] (narrow) %v5678_v43, 8 }
 0x51f   :  { %3308 = vxpose.xlu1.b32.end [16/16] (narrow) %v5920_v30, 8  ;;  %3332 = vxpose.xlu0.b32.cont [8/16] (narrow) %v5921_v36, 8 }
 0x523   :  { %3357 = vxpose.xlu1.b32.start [1/16] (narrow) %v5708_v23, 8  ;;  %3333 = vxpose.xlu0.b32.cont [9/16] (narrow) %v5684_v51, 8  ;;  %v3245_v35 = vpop.trf.xlu1 }
 0x524   :  { %3400 = vst [vmem:[#allocation8 + $0x58] sm:$0xff] %v3245_v35 }
 0x527   :  { %3358 = vxpose.xlu1.b32.cont [2/16] (narrow) %v5706_v50, 8  ;;  %3334 = vxpose.xlu0.b32.cont [10/16] (narrow) %v5922_v1, 8 }
 0x52b   :  { %3359 = vxpose.xlu1.b32.cont [3/16] (narrow) %v5714_v11, 8  ;;  %3335 = vxpose.xlu0.b32.cont [11/16] (narrow) %v5690_v47, 8 }
 0x52f   :  { %3360 = vxpose.xlu1.b32.cont [4/16] (narrow) %v5712_v59, 8  ;;  %3336 = vxpose.xlu0.b32.cont [12/16] (narrow) %v5688_v55, 8 }
 0x533   :  { %3361 = vxpose.xlu1.b32.cont [5/16] (narrow) %v5722_v34, 8  ;;  %3337 = vxpose.xlu0.b32.cont [13/16] (narrow) %v5696_v29, 8 }
 0x537   :  { %3362 = vxpose.xlu1.b32.cont [6/16] (narrow) %v5720_v56, 8  ;;  %3338 = vxpose.xlu0.b32.cont [14/16] (narrow) %v5694_v46, 8 }
 0x53b   :  { %3363 = vxpose.xlu1.b32.cont [7/16] (narrow) %v5730_v45, 8  ;;  %3339 = vxpose.xlu0.b32.cont [15/16] (narrow) %v5702_v62, 8 }
 0x53f   :  { %3364 = vxpose.xlu1.b32.cont [8/16] (narrow) %v5728_v37, 8  ;;  %3340 = vxpose.xlu0.b32.end [16/16] (narrow) %v5700_v60, 8 }
 0x543   :  { %3365 = vxpose.xlu1.b32.cont [9/16] (narrow) %v5738_v6, 8  ;;  %v3277_v10 = vpop.trf.xlu0 }
 0x544   :  { %3401 = vst [vmem:[#allocation8 + $0x60] sm:$0xff] %v3277_v10 }
 0x547   :  { %3366 = vxpose.xlu1.b32.cont [10/16] (narrow) %v5736_v44, 8 }
 0x54b   :  { %3367 = vxpose.xlu1.b32.cont [11/16] (narrow) %v5746_v13, 8 }
 0x54f   :  { %3368 = vxpose.xlu1.b32.cont [12/16] (narrow) %v5744_v9, 8 }
 0x553   :  { %3369 = vxpose.xlu1.b32.cont [13/16] (narrow) %v5754_v4, 8 }
 0x557   :  { %3370 = vxpose.xlu1.b32.cont [14/16] (narrow) %v5752_v2, 8 }
 0x55b   :  { %3371 = vxpose.xlu1.b32.cont [15/16] (narrow) %v5762_v61, 8 }
 0x55f   :  { %3372 = vxpose.xlu1.b32.end [16/16] (narrow) %v5760_v18, 8 }
 0x563   :  { %v3309_v52 = vpop.trf.xlu1 }
 0x564   :  { %3402 = vst [vmem:[#allocation8 + $0x68] sm:$0xff] %v3309_v52 }
 0x583   :  { %v3341_v15 = vpop.trf.xlu0 }
 0x584   :  { %3403 = vst [vmem:[#allocation8 + $0x70] sm:$0xff] %v3341_v15 }
 0x5a3   :  { %v3373_v41 = vpop.trf.xlu1 }
 0x5a4   :  { %3404 = vst [vmem:[#allocation8 + $0x78] sm:$0xff] %v3373_v41 }
 0x5a5   :  { %4473 = shalt.err (!%p4470_p0)
}
 0x5a6   :  { %s4474_s25 = scalar_lea.hbm %s5842_s3, 2048 }
 0x5a7   :  { %p4475_p1 = scmp.ne.s32.totalorder %s5842_s3, %s4474_s25  ;;  %p4478_p2 = scmp.lt.u32.totalorder %s4474_s25, %s5842_s3 }
 0x5a9   :  { %p4480_p3 = pnand %p4478_p2, %p4475_p1 }
 0x5ab   :  { %4483 = shalt.err (!%p4480_p3)
}
 0x5ac   :  { %3416 = dma.vmem_to_hbm [thread:$0]  %s3411_s21, 2048, %s5842_s3, [#allocation4], %s4492_s1, %s4492_s1, %s4493_s7  }
 0x5ad   :  { %4488 = dma.done.wait [#allocation4], 2048  }
 0x5ae   :  { %4489 = vsyncadd [#allocation4], 4294965248 }
 0x5af   :  { %3420 = vsyncpa [#allocation3], 1 }
 0x5b0   :  { %3421 = vsyncpa [#allocation6], 1 }
 0x5b1   :  { %3422 = vsyncpa [#allocation4], 1 }

</bundles_post_ra>
